<compile_context>
chip_gen: v7x
topology: tpu7x:2x2x1
jax: 0.10.0
libtpu: 0.0.40
codegen_flags: <defaults>
</compile_context>

<pallas_src>
import functools
import numpy as np
import jax
import jax.numpy as jnp
from jax.experimental import pallas as pl
from jax.experimental.pallas import tpu as pltpu

N_FFT = 64                    # synthetic STFT size (librosa default 2048; same algorithm)
HOP = 16
N_BINS = N_FFT // 2 + 1       # 33 real bins
LANES = 128                   # TPU lane width; bins zero-padded to a full lane tile
SR = 44100.0


def _hann(n):
    # periodic hann, as used by librosa
    k = np.arange(n)
    return (0.5 - 0.5 * np.cos(2.0 * np.pi * k / n)).astype(np.float32)


def _analysis_matrix():
    """(N_FFT, 2*LANES) bf16 windowed-DFT matrix.
    Lanes [0,128): real part, lanes [128,256): imag part (first N_BINS lanes of each
    half are non-zero). Padding keeps every output lane-dense and fuses re/im into a
    single MXU matmul."""
    n = np.arange(N_FFT)[:, None].astype(np.float64)
    f = np.arange(N_BINS)[None, :].astype(np.float64)
    theta = 2.0 * np.pi * f * n / N_FFT
    win = _hann(N_FFT)[:, None].astype(np.float64)
    w = np.zeros((N_FFT, 2 * LANES), np.float32)
    w[:, :N_BINS] = win * np.cos(theta)
    w[:, LANES:LANES + N_BINS] = -win * np.sin(theta)
    return jnp.asarray(w, dtype=jnp.bfloat16)


def _synthesis_matrix():
    """(2*LANES, LANES) bf16 inverse-DFT matrix.
    Rows [0,128): weights for Re(X), rows [128,256): weights for Im(X); columns
    [0,N_FFT) hold the windowed time samples, the rest are zero so the kernel output
    stays 128-lane dense (sliced back to 64 in cheap XLA glue)."""
    f = np.arange(N_BINS)[:, None].astype(np.float64)
    n = np.arange(N_FFT)[None, :].astype(np.float64)
    theta = 2.0 * np.pi * f * n / N_FFT
    wt = np.full((N_BINS, 1), 2.0)        # conjugate-symmetry weights
    wt[0, 0] = 1.0
    wt[-1, 0] = 1.0
    win = _hann(N_FFT)[None, :].astype(np.float64)
    b = np.zeros((2 * LANES, LANES), np.float32)
    b[:N_BINS, :N_FFT] = wt * np.cos(theta) * win / N_FFT
    b[LANES:LANES + N_BINS, :N_FFT] = -wt * np.sin(theta) * win / N_FFT
    return jnp.asarray(b, dtype=jnp.bfloat16)


# ---------------- Pallas kernels ----------------

def _stft_kernel(f_ref, w_ref, d_ref):
    # (C*n_frames, 64) bf16 @ (64, 256) bf16 -> (C*n_frames, 256) f32 : one MXU matmul
    d_ref[...] = jnp.dot(f_ref[...], w_ref[...], preferred_element_type=jnp.float32)


def _synth_kernel(d0_ref, d1_ref, alpha_ref, phase_ref, b_ref, y_ref):
    # Fused phase-vocoder magnitude interpolation + ISTFT synthesis.
    d0 = d0_ref[...]                               # (M, 256) f32: [re | im]
    d1 = d1_ref[...]
    r0, i0 = d0[:, :LANES], d0[:, LANES:]
    r1, i1 = d1[:, :LANES], d1[:, LANES:]
    mag0 = jnp.sqrt(r0 * r0 + i0 * i0)
    mag1 = jnp.sqrt(r1 * r1 + i1 * i1)
    a = alpha_ref[...]                             # (M, 1) -> lane-broadcast
    mag = (1.0 - a) * mag0 + a * mag1
    p = phase_ref[...]                             # (M, 128) f32 accumulated phase
    s = jnp.concatenate([mag * jnp.cos(p), mag * jnp.sin(p)], axis=1)
    y_ref[...] = jnp.dot(s.astype(jnp.bfloat16), b_ref[...],
                         preferred_element_type=jnp.float32)


# ---------------- pallas_call wrappers (grid-less, whole arrays in VMEM) ----------------

def _vmem():
    return pl.BlockSpec(memory_space=pltpu.MemorySpace.VMEM)


def _stft_pallas(frames_bf16, w_bf16):
    m = frames_bf16.shape[0]
    return pl.pallas_call(
        _stft_kernel,
        in_specs=[_vmem(), _vmem()],
        out_specs=_vmem(),
        out_shape=jax.ShapeDtypeStruct((m, 2 * LANES), jnp.float32),
    )(frames_bf16, w_bf16)


def _synth_pallas(d0, d1, alpha_col, phase, b_mat):
    m = d0.shape[0]
    return pl.pallas_call(
        _synth_kernel,
        in_specs=[_vmem(), _vmem(), _vmem(), _vmem(), _vmem()],
        out_specs=_vmem(),
        out_shape=jax.ShapeDtypeStruct((m, LANES), jnp.float32),
    )(d0, d1, alpha_col, phase, b_mat)


# ---------------- forward pass ----------------

def pitch_shift_forward(x, semitone):
    """librosa.effects.pitch_shift(sr=44100, n_steps=semitone) for x of shape (C, T)."""
    rate = 2.0 ** (-float(semitone) / 12.0)
    c, len_x = x.shape

    w_mat = _analysis_matrix()
    b_mat = _synthesis_matrix()

    # ---- STFT (center=True) ----
    pad = N_FFT // 2
    x_pad = jnp.pad(x, ((0, 0), (pad, pad)))
    tp = len_x + 2 * pad
    n_frames = 1 + (tp - N_FFT) // HOP
    k_hops = N_FFT // HOP                                   # 4 hop-chunks per frame
    n_hops = n_frames + k_hops - 1
    h = x_pad[:, :n_hops * HOP].reshape(c, n_hops, HOP)
    # structured framing: shifted slices + concat (no gather, no 4x scatter)
    frames = jnp.concatenate([h[:, k:k + n_frames, :] for k in range(k_hops)], axis=2)
    frames = frames.reshape(c * n_frames, N_FFT).astype(jnp.bfloat16)

    d = _stft_pallas(frames, w_mat).reshape(c, n_frames, 2 * LANES)   # f32

    # ---- phase vocoder (trace-time index math; rate & shapes are static) ----
    n_steps = int(np.ceil(n_frames / rate))
    steps = np.arange(n_steps) * rate
    idx0 = np.floor(steps).astype(np.int32)
    alpha = (steps - np.floor(steps)).astype(np.float32)
    phi = np.zeros((1, LANES), np.float32)
    phi[0, :N_BINS] = np.linspace(0.0, np.pi * HOP, N_BINS)
    phi_j = jnp.asarray(phi)

    d_pad = jnp.pad(d, ((0, 0), (0, 2), (0, 0)))
    d0 = d_pad[:, idx0, :]                                  # (c, n_steps, 256)
    d1 = d_pad[:, idx0 + 1, :]
    r0, i0 = d0[..., :LANES], d0[..., LANES:]
    r1, i1 = d1[..., :LANES], d1[..., LANES:]

    # phase advance via angle(z1 * conj(z0)): a single arctan2 in XLA glue
    # (arctan2 has no guaranteed Mosaic lowering; everything else is in-kernel).
    dphase = jnp.arctan2(i1 * r0 - r1 * i0, r1 * r0 + i1 * i0)
    two_pi = 2.0 * np.pi
    dd = dphase - phi_j
    dd = dd - two_pi * jnp.floor(dd / two_pi + 0.5)         # wrap to [-pi, pi)
    dstep = phi_j + dd                                      # (c, n_steps, 128)

    init_phase = jnp.arctan2(d[:, 0, LANES:], d[:, 0, :LANES])        # (c, 128)
    acc = jnp.concatenate(
        [jnp.zeros((c, 1, LANES), jnp.float32), jnp.cumsum(dstep[:, :-1, :], axis=1)],
        axis=1)                                             # serial cumsum stays in XLA
    phase = (init_phase[:, None, :] + acc).reshape(c * n_steps, LANES)
    alpha_col = jnp.asarray(np.tile(alpha, c)[:, None])     # (c*n_steps, 1)

    # ---- fused PV + ISTFT kernel ----
    yframes = _synth_pallas(d0.reshape(c * n_steps, 2 * LANES),
                            d1.reshape(c * n_steps, 2 * LANES),
                            alpha_col, phase, b_mat)
    yframes = yframes.reshape(c, n_steps, LANES)[:, :, :N_FFT]

    # ---- overlap-add: 4 structured shifted adds instead of a scatter ----
    yf = yframes.reshape(c, n_steps, k_hops, HOP)
    n_out_hops = n_steps + k_hops - 1
    y = sum(jnp.pad(yf[:, :, k, :], ((0, 0), (k, k_hops - 1 - k), (0, 0)))
            for k in range(k_hops))
    y = y.reshape(c, n_out_hops * HOP)

    # window sum-square envelope is data-independent -> build its reciprocal on host
    win_sq = (_hann(N_FFT) ** 2).reshape(k_hops, HOP)
    env = np.zeros((n_out_hops, HOP), np.float32)
    for k in range(k_hops):
        env[k:k + n_steps] += win_sq[k]
    env = env.reshape(-1)
    inv_env = (1.0 / np.where(env > 1e-8, env, 1.0)).astype(np.float32)
    y = y * jnp.asarray(inv_env)[None, :]

    # librosa istft (center=True): trim n_fft//2 from both ends
    stretch_len = HOP * (n_steps - 1)
    stretched = y[:, pad:pad + stretch_len]

    # ---- resample back (orig_sr = SR/rate -> SR), then fix_length to len_x ----
    # TODO(synk): librosa uses the soxr_hq polyphase resampler; approximated here with
    # linear interpolation using static trace-time indices.
    pos = np.arange(len_x, dtype=np.float64) / rate
    base = np.minimum(np.floor(pos).astype(np.int32), stretch_len - 1)
    frac = (pos - np.floor(pos)).astype(np.float32)
    stretched_p = jnp.pad(stretched, ((0, 0), (0, 1)))
    g0 = jnp.take(stretched_p, jnp.asarray(base), axis=1)
    g1 = jnp.take(stretched_p, jnp.asarray(base + 1), axis=1)
    frac_j = jnp.asarray(frac)[None, :]
    out = (1.0 - frac_j) * g0 + frac_j * g1
    return out.astype(x.dtype)


class PitchShift:
    """Pallas/JAX equivalent of the PyTorch PitchShift module (per-channel
    librosa.effects.pitch_shift at sr=44100, n_steps=semitone)."""
    # TODO(synk): the PyTorch module's host round-trip (x.detach().numpy()) has no
    # device-kernel equivalent; it is semantics-neutral and omitted.

    def __init__(self, semitone):
        self.semitone = semitone
        self._fn = jax.jit(functools.partial(pitch_shift_forward, semitone=semitone))

    def __call__(self, x):
        return self._fn(x)


if __name__ == "__main__":
    key = jax.random.PRNGKey(0)
    len_x = 512
    x = jax.random.normal(key, (2, len_x), dtype=jnp.float32)

    out_up = jax.block_until_ready(PitchShift(2)(x))     # +2 semitones (rate < 1)
    out_dn = jax.block_until_ready(PitchShift(-3)(x))    # -3 semitones (rate > 1)

    assert out_up.shape == x.shape and out_up.dtype == x.dtype
    assert out_dn.shape == x.shape and out_dn.dtype == x.dtype
    assert bool(jnp.all(jnp.isfinite(out_up))) and bool(jnp.all(jnp.isfinite(out_dn)))
    print("KERNEL_OK")
</pallas_src>

<mosaic_0001>
module attributes {stable_mosaic.version = 11 : i64} {
  func.func @_stft_kernel(%arg0: memref<66x64xbf16, #tpu.memory_space<vmem>>, %arg1: memref<64x256xbf16, #tpu.memory_space<vmem>>, %arg2: memref<66x256xf32, #tpu.memory_space<vmem>>) attributes {dimension_semantics = [], scalar_prefetch = 0 : i64, scratch_operands = 0 : i64, tpu.core_type = #tpu.core_type<tc>} {
    %c0 = arith.constant 0 : index
    %c0_0 = arith.constant 0 : index
    %0 = vector.load %arg0[%c0, %c0_0] : memref<66x64xbf16, #tpu.memory_space<vmem>>, vector<66x64xbf16>
    %c0_1 = arith.constant 0 : index
    %c0_2 = arith.constant 0 : index
    %1 = vector.load %arg1[%c0_1, %c0_2] : memref<64x256xbf16, #tpu.memory_space<vmem>>, vector<64x256xbf16>
    %cst = arith.constant dense<0.000000e+00> : vector<66x256xf32>
    %2 = tpu.matmul %0, %1, %cst {dimension_numbers = #tpu.dot_dimension_numbers<[1], [0], [0], [1], [0, 0, 1, 1], [], []>} : vector<66x64xbf16>, vector<64x256xbf16>, vector<66x256xf32> -> vector<66x256xf32>
    %c0_3 = arith.constant 0 : index
    %c0_4 = arith.constant 0 : index
    %3 = vector.load %arg2[%c0_3, %c0_4] : memref<66x256xf32, #tpu.memory_space<vmem>>, vector<66x256xf32>
    tpu.vector_store %arg2[%c0_3, %c0_4], %2 {strides = array<i32>} : memref<66x256xf32, #tpu.memory_space<vmem>>, vector<66x256xf32>,
    return
  }
}

module attributes {stable_mosaic.version = 11 : i64} {
  func.func @_synth_kernel(%arg0: memref<76x256xf32, #tpu.memory_space<vmem>>, %arg1: memref<76x256xf32, #tpu.memory_space<vmem>>, %arg2: memref<76x1xf32, #tpu.memory_space<vmem>>, %arg3: memref<76x128xf32, #tpu.memory_space<vmem>>, %arg4: memref<256x128xbf16, #tpu.memory_space<vmem>>, %arg5: memref<76x128xf32, #tpu.memory_space<vmem>>) attributes {dimension_semantics = [], scalar_prefetch = 0 : i64, scratch_operands = 0 : i64, tpu.core_type = #tpu.core_type<tc>} {
    %c0 = arith.constant 0 : index
    %c0_0 = arith.constant 0 : index
    %0 = vector.load %arg0[%c0, %c0_0] : memref<76x256xf32, #tpu.memory_space<vmem>>, vector<76x256xf32>
    %c0_1 = arith.constant 0 : index
    %c0_2 = arith.constant 0 : index
    %1 = vector.load %arg1[%c0_1, %c0_2] : memref<76x256xf32, #tpu.memory_space<vmem>>, vector<76x256xf32>
    %2 = vector.extract_strided_slice %0 {offsets = [0, 0], sizes = [76, 128], strides = [1, 1]} : vector<76x256xf32> to vector<76x128xf32>
    %3 = vector.extract_strided_slice %0 {offsets = [0, 128], sizes = [76, 128], strides = [1, 1]} : vector<76x256xf32> to vector<76x128xf32>
    %4 = vector.extract_strided_slice %1 {offsets = [0, 0], sizes = [76, 128], strides = [1, 1]} : vector<76x256xf32> to vector<76x128xf32>
    %5 = vector.extract_strided_slice %1 {offsets = [0, 128], sizes = [76, 128], strides = [1, 1]} : vector<76x256xf32> to vector<76x128xf32>
    %6 = arith.mulf %2, %2 : vector<76x128xf32>
    %7 = arith.mulf %3, %3 : vector<76x128xf32>
    %8 = arith.addf %6, %7 : vector<76x128xf32>
    %9 = math.sqrt %8 : vector<76x128xf32>
    %10 = arith.mulf %4, %4 : vector<76x128xf32>
    %11 = arith.mulf %5, %5 : vector<76x128xf32>
    %12 = arith.addf %10, %11 : vector<76x128xf32>
    %13 = math.sqrt %12 : vector<76x128xf32>
    %c0_3 = arith.constant 0 : index
    %c0_4 = arith.constant 0 : index
    %14 = vector.load %arg2[%c0_3, %c0_4] : memref<76x1xf32, #tpu.memory_space<vmem>>, vector<76x1xf32>
    %cst = arith.constant 1.000000e+00 : f32
    %15 = vector.broadcast %cst : f32 to vector<76x1xf32>
    %16 = arith.subf %15, %14 : vector<76x1xf32>
    %17 = vector.broadcast %16 : vector<76x1xf32> to vector<76x128xf32>
    %18 = arith.mulf %17, %9 : vector<76x128xf32>
    %19 = vector.broadcast %14 : vector<76x1xf32> to vector<76x128xf32>
    %20 = arith.mulf %19, %13 : vector<76x128xf32>
    %21 = arith.addf %18, %20 : vector<76x128xf32>
    %c0_5 = arith.constant 0 : index
    %c0_6 = arith.constant 0 : index
    %22 = vector.load %arg3[%c0_5, %c0_6] : memref<76x128xf32, #tpu.memory_space<vmem>>, vector<76x128xf32>
    %23 = math.cos %22 : vector<76x128xf32>
    %24 = arith.mulf %21, %23 : vector<76x128xf32>
    %25 = math.sin %22 : vector<76x128xf32>
    %26 = arith.mulf %21, %25 : vector<76x128xf32>
    %27 = tpu.concatenate %24, %26 in 1 : vector<76x128xf32>, vector<76x128xf32> -> vector<76x256xf32>
    %28 = arith.truncf %27 : vector<76x256xf32> to vector<76x256xbf16>
    %c0_7 = arith.constant 0 : index
    %c0_8 = arith.constant 0 : index
    %29 = vector.load %arg4[%c0_7, %c0_8] : memref<256x128xbf16, #tpu.memory_space<vmem>>, vector<256x128xbf16>
    %cst_9 = arith.constant dense<0.000000e+00> : vector<76x128xf32>
    %30 = tpu.matmul %28, %29, %cst_9 {dimension_numbers = #tpu.dot_dimension_numbers<[1], [0], [0], [1], [0, 0, 1, 1], [], []>} : vector<76x256xbf16>, vector<256x128xbf16>, vector<76x128xf32> -> vector<76x128xf32>
    %c0_10 = arith.constant 0 : index
    %c0_11 = arith.constant 0 : index
    %31 = vector.load %arg5[%c0_10, %c0_11] : memref<76x128xf32, #tpu.memory_space<vmem>>, vector<76x128xf32>
    tpu.vector_store %arg5[%c0_10, %c0_11], %30 {strides = array<i32>} : memref<76x128xf32, #tpu.memory_space<vmem>>, vector<76x128xf32>,
    return
  }
}

</mosaic_0001>

<bundles_post_ra>
// kernel: pitch_shift_forward.2
= control target key start
LH: loop header
LB: loop body
LE: loop exit
PB: predicated region body
PF: predicated region fallthrough
CT: control target
= control target key end

     0   :  { %v255_v1 = vmov 0   ;;  %vm92_vm0 = vcmask 523264   ;;  %s364_s1 = inlined_call_operand.vmem [shape: bf16[64,256], index: 1, kind: input, shape index: {}]   ;;  %s365_s0 = inlined_call_operand.vmem [shape: bf16[66,64], index: 0, kind: input, shape index: {}]   ;;  %s366_s2 = inlined_call_operand.vmem [shape: f32[66,256], index: 2, kind: output, shape index: {}]  }
   0x1   :  { %v238_v0 = vld [vmem:[%s364_s1 + $0x4] ss:$8 sps:$4 sm:$0xff]   ;;  %140 = vmatprep.mubr.bf16.mxu0 %v255_v1  ;;  %170 = vmatprep.mubr.bf16.mxu1 %v255_v1  ;;  %v240_v2 = vld [vmem:[%s364_s1] ss:$8 sps:$4 sm:$0xff]   ;;  %v241_v3 = vld [vmem:[%s364_s1 + $0x14] ss:$8 sps:$4 sm:$0xff]  }
   0x2   :  { %108 = vmatprep.subr.bf16.mxu0 %v238_v0  ;;  %229 = vmatprep.subr.bf16.mxu1 %v238_v0  ;;  %v243_v4 = vld [vmem:[%s364_s1 + $0x10] ss:$8 sps:$4 sm:$0xff]   ;;  %v244_v5 = vld [vmem:[%s364_s1 + $0x24] ss:$8 sps:$4 sm:$0xff]   ;;  %v246_v6 = vld [vmem:[%s364_s1 + $0x20] ss:$8 sps:$4 sm:$0xff]  }
   0x3   :  { %109 = vmatpush1.bf16.msra.mxu0 %v240_v2  ;;  %233 = vmatpush1.bf16.msra.mxu1 %v240_v2  ;;  %v247_v7 = vld [vmem:[%s364_s1 + $0x34] ss:$8 sps:$4 sm:$0xff]   ;;  %v249_v8 = vld [vmem:[%s364_s1 + $0x30] ss:$8 sps:$4 sm:$0xff]   ;;  %v250_v9 = vld [vmem:[%s365_s0] sm:$0xff]  }
   0x4   :  { %110 = vmatprep.subr.bf16.mxu0 %v241_v3  ;;  %230 = vmatprep.subr.bf16.mxu1 %v241_v3  ;;  %v251_v10 = vld [vmem:[%s365_s0 + $0x18] sm:$0xff]   ;;  %v252_v11 = vld [vmem:[%s365_s0 + $0x8] sm:$0xff]   ;;  %v253_v12 = vld [vmem:[%s365_s0 + $0x20] ss:$0 sps:$4 sm:$0x11]  }
   0x5   :  { %v254_v13 = vld [vmem:[%s365_s0 + $0x10] sm:$0xff]  }
   0x7   :  { %111 = vmatpush1.bf16.msra.mxu0 %v243_v4  ;;  %234 = vmatpush1.bf16.msra.mxu1 %v243_v4 }
   0x8   :  { %112 = vmatprep.subr.bf16.mxu0 %v244_v5  ;;  %231 = vmatprep.subr.bf16.mxu1 %v244_v5 }
   0xb   :  { %113 = vmatpush1.bf16.msra.mxu0 %v246_v6  ;;  %235 = vmatpush1.bf16.msra.mxu1 %v246_v6 }
   0xc   :  { %114 = vmatprep.subr.bf16.mxu0 %v247_v7  ;;  %232 = vmatprep.subr.bf16.mxu1 %v247_v7 }
   0xf   :  { %115 = vmatpush1.bf16.msra.mxu0 %v249_v8  ;;  %236 = vmatpush1.bf16.msra.mxu1 %v249_v8 }
  0x12   :  { %224 = vmatmul.mubr.msk.bf16.vlgmr.msra.gmra.mrb[0].mxu0 %vm92_vm0, %v250_v9  ;;  %227 = vmatmul.mubr.msk.bf16.vlgmr.msra.gmra.mrb[0].mxu1 %vm92_vm0, %v251_v10 }
  0x13   :  { %150 = vmatprep.mubr.bf16.mxu0 %v255_v1  ;;  %180 = vmatprep.mubr.bf16.mxu1 %v255_v1 }
  0x1a   :  { %225 = vmatmul.mubr.msk.bf16.gmra.mrb[4].mxu0 %vm92_vm0, %v252_v11  ;;  %228 = vmatmul.mubr.msk.bf16.gmra.mrb[4].mxu1 %vm92_vm0, %v253_v12 }
  0x1b   :  { %160 = vmatprep.mubr.bf16.mxu0 %v255_v1 }
  0x22   :  { %226 = vmatmul.mubr.msk.bf16.gmra.mrb[8].mxu0 %vm92_vm0, %v254_v13 }
  0xe5   :  { %v142_v14 = vpop.f32.mrb[0].mxu0  ;;  %v172_v15 = vpop.f32.mrb[0].mxu1 }
  0xe6   :  { %189 = vst [vmem:[%s366_s2] sm:$0xff] %v142_v14  ;;  %v144_v16 = vpop.f32.mrb[1].mxu0  ;;  %201 = vst [vmem:[%s366_s2 + $0x60] sm:$0xff] %v172_v15  ;;  %v174_v17 = vpop.f32.mrb[1].mxu1 }
  0xe7   :  { %190 = vst [vmem:[%s366_s2 + $0x8] sm:$0xff] %v144_v16  ;;  %v146_v18 = vpop.f32.mrb[2].mxu0  ;;  %202 = vst [vmem:[%s366_s2 + $0x68] sm:$0xff] %v174_v17  ;;  %v176_v19 = vpop.f32.mrb[2].mxu1 }
  0xe8   :  { %191 = vst [vmem:[%s366_s2 + $0x10] sm:$0xff] %v146_v18  ;;  %v148_v20 = vpop.f32.mrb[3].mxu0  ;;  %203 = vst [vmem:[%s366_s2 + $0x70] sm:$0xff] %v176_v19  ;;  %v178_v21 = vpop.f32.mrb[3].mxu1 }
  0xe9   :  { %192 = vst [vmem:[%s366_s2 + $0x18] sm:$0xff] %v148_v20  ;;  %204 = vst [vmem:[%s366_s2 + $0x78] sm:$0xff] %v178_v21 }
  0xed   :  { %v152_v22 = vpop.f32.mrb[4].mxu0  ;;  %v182_v23 = vpop.f32.mrb[4].mxu1 }
  0xee   :  { %193 = vst [vmem:[%s366_s2 + $0x20] sm:$0xff] %v152_v22  ;;  %v154_v24 = vpop.f32.mrb[5].mxu0  ;;  %205 = vst [vmem:[%s366_s2 + $0x80] sm:$0x3] %v182_v23  ;;  %v184_v25 = vpop.f32.mrb[5].mxu1 }
  0xef   :  { %194 = vst [vmem:[%s366_s2 + $0x28] sm:$0xff] %v154_v24  ;;  %v156_v26 = vpop.f32.mrb[6].mxu0  ;;  %206 = vst [vmem:[%s366_s2 + $0x88] sm:$0x3] %v184_v25  ;;  %v186_v27 = vpop.f32.mrb[6].mxu1 }
  0xf0   :  { %195 = vst [vmem:[%s366_s2 + $0x30] sm:$0xff] %v156_v26  ;;  %v158_v28 = vpop.f32.mrb[7].mxu0  ;;  %v187_v29 = vpop.f32.mrb[7].mxu1 }
  0xf1   :  { %196 = vst [vmem:[%s366_s2 + $0x38] sm:$0xff] %v158_v28 }
  0xf5   :  { %v162_v30 = vpop.f32.mrb[8].mxu0 }
  0xf6   :  { %197 = vst [vmem:[%s366_s2 + $0x40] sm:$0xff] %v162_v30  ;;  %v164_v31 = vpop.f32.mrb[9].mxu0 }
  0xf7   :  { %198 = vst [vmem:[%s366_s2 + $0x48] sm:$0xff] %v164_v31  ;;  %v166_v32 = vpop.f32.mrb[10].mxu0 }
  0xf8   :  { %199 = vst [vmem:[%s366_s2 + $0x50] sm:$0xff] %v166_v32  ;;  %v168_v33 = vpop.f32.mrb[11].mxu0 }
  0xf9   :  { %200 = vst [vmem:[%s366_s2 + $0x58] sm:$0xff] %v168_v33 }

// kernel: pitch_shift_forward.3
= control target key start
LH: loop header
LB: loop body
LE: loop exit
PB: predicated region body
PF: predicated region fallthrough
CT: control target
= control target key end

     0   :  { %v3040_v0 = vmov 0   ;;  %s4655_s2 = inlined_call_operand.vmem [shape: f32[76,1], index: 2, kind: input, shape index: {}]   ;;  %s4656_s4 = inlined_call_operand.vmem [shape: bf16[256,128], index: 4, kind: input, shape index: {}]   ;;  %s4657_s3 = inlined_call_operand.vmem [shape: f32[76,128], index: 3, kind: input, shape index: {}]   ;;  %s4658_s1 = inlined_call_operand.vmem [shape: f32[76,256], index: 1, kind: input, shape index: {}]   ;;  %s4659_s0 = inlined_call_operand.vmem [shape: f32[76,256], index: 0, kind: input, shape index: {}]   ;;  %s4660_s5 = inlined_call_operand.vmem [shape: f32[76,128], index: 5, kind: output, shape index: {}]  }
   0x1   :  { %2941 = vset.pattern.permute.xlu1 %v3040_v0  ;;  %v261_v1 = vld [vmem:[%s4655_s2] sm:$0xff]  ;;  %2942 = vset.pattern.permute.xlu0 %v3040_v0  ;;  %v262_v2 = vld [vmem:[%s4655_s2 + $0x8] sm:$0xff]  ;;  %v264_v4 = vld [vmem:[%s4655_s2 + $0x18] sm:$0xff] }
   0x2   :  { %343 = vperm.xlu1 %2941, %v261_v1   ;;  %v271_v3 = vsub.f32 1.0, %v261_v1  ;;  %v272_v5 = vsub.f32 1.0, %v262_v2  ;;  %v263_v6 = vld [vmem:[%s4655_s2 + $0x10] sm:$0xff]  ;;  %v2943_v7 = vld [vmem:[%s4656_s4 + $0x40] sm:$0xff]   ;;  %v274_v8 = vsub.f32 1.0, %v264_v4  ;;  %v268_v9 = vld [vmem:[%s4655_s2 + $0x38] sm:$0xff] }
   0x3   :  { %v2944_v10 = vld [vmem:[%s4656_s4] sm:$0xff]   ;;  %2832 = vmatprep.subr.bf16.mxu0 %v2943_v7  ;;  %v267_v11 = vld [vmem:[%s4655_s2 + $0x30] sm:$0xff]  ;;  %v2945_v12 = vld [vmem:[%s4656_s4 + $0x48] sm:$0xff]   ;;  %2878 = vmatprep.subr.bf16.mxu1 %v2943_v7  ;;  %v273_v13 = vsub.f32 1.0, %v263_v6  ;;  %v278_v16 = vsub.f32 1.0, %v268_v9 }
   0x4   :  { %283 = vperm.xlu0 %2942, %v271_v3   ;;  %2833 = vmatpush3.bf16.msra.mxu0 %v2944_v10  ;;  %v2946_v14 = vld [vmem:[%s4656_s4 + $0x8] sm:$0xff]   ;;  %v2947_v15 = vld [vmem:[%s4656_s4 + $0x50] sm:$0xff]   ;;  %v277_v18 = vsub.f32 1.0, %v267_v11  ;;  %v2949_v19 = vld [vmem:[%s4656_s4 + $0x58] sm:$0xff]   ;;  %v3043_v7 = vmov 2131351028  }
   0x5   :  { %2886 = vmatpush3.bf16.msra.mxu1 %v2944_v10  ;;  %2834 = vmatprep.subr.bf16.mxu0 %v2945_v12  ;;  %v2948_v17 = vld [vmem:[%s4656_s4 + $0x10] sm:$0xff]   ;;  %v2950_v20 = vld [vmem:[%s4656_s4 + $0x18] sm:$0xff]   ;;  %v2951_v21 = vld [vmem:[%s4656_s4 + $0x60] sm:$0xff]  }
   0x6   :  { %348 = vperm.xlu1 %2941, %v262_v2   ;;  %2879 = vmatprep.subr.bf16.mxu1 %v2945_v12  ;;  %v266_v22 = vld [vmem:[%s4655_s2 + $0x28] sm:$0xff]  ;;  %v2952_v23 = vld [vmem:[%s4656_s4 + $0x20] sm:$0xff]   ;;  %v2955_v30 = vld [vmem:[%s4656_s4 + $0x70] sm:$0xff]   ;;  %v3041_v2 = vmov 683565275  }
   0x7   :  { %v2953_v24 = vld [vmem:[%s4656_s4 + $0x68] sm:$0xff]   ;;  %v265_v25 = vld [vmem:[%s4655_s2 + $0x20] sm:$0xff]  ;;  %v276_v26 = vsub.f32 1.0, %v266_v22  ;;  %v2956_v33 = vld [vmem:[%s4656_s4 + $0x30] sm:$0xff]  }
   0x8   :  { %288 = vperm.xlu0 %2942, %v272_v5   ;;  %2835 = vmatpush3.bf16.msra.mxu0 %v2946_v14  ;;  %v270_v27 = vld [vmem:[%s4655_s2 + $0x48] sm:$0xf]  ;;  %v275_v29 = vsub.f32 1.0, %v265_v25  ;;  %v269_v31 = vld [vmem:[%s4655_s2 + $0x40] sm:$0xff]  ;;  %v2957_v36 = vld [vmem:[%s4656_s4 + $0x78] sm:$0xff]  }
   0x9   :  { %2836 = vmatprep.subr.bf16.mxu0 %v2947_v15  ;;  %2887 = vmatpush3.bf16.msra.mxu1 %v2946_v14  ;;  %v2954_v28 = vld [vmem:[%s4656_s4 + $0x28] sm:$0xff]   ;;  %v280_v32 = vsub.f32 1.0, %v270_v27  ;;  %v3152_v34 = vld [vmem:[%s4657_s3] sm:$0xff]  ;;  %v279_v35 = vsub.f32 1.0, %v269_v31  ;;  %v2958_v38 = vld [vmem:[%s4656_s4 + $0x38] sm:$0xff]  }
   0xa   :  { %298 = vperm.xlu1 %2941, %v274_v8   ;;  %2880 = vmatprep.subr.bf16.mxu1 %v2947_v15  ;;  %v424_v37 = vand.u32 2139095040, %v3152_v34  ;;  %v3164_v40 = vld [vmem:[%s4657_s3 + $0x8] sm:$0xff]  ;;  %v421_v41 = vand.u32 2147483647, %v3152_v34  ;;  %v41_v42 = vld [vmem:[%s4658_s1] sm:$0xff]  ;;  %v43_v54 = vld [vmem:[%s4658_s1 + $0x10] sm:$0xff] }
   0xb   :  { %v42_v43 = vld [vmem:[%s4658_s1 + $0x8] sm:$0xff]  ;;  %v21_v44 = vld [vmem:[%s4659_s0] sm:$0xff]  ;;  %v527_v47 = vand.u32 2139095040, %v3164_v40  ;;  %v161_v48 = vmul.f32 %v41_v42, %v41_v42  ;;  %v44_v55 = vld [vmem:[%s4658_s1 + $0x18] sm:$0xff]  ;;  %v162_v62 = vmul.f32 %v43_v54, %v43_v54  ;;  %v3042_v5 = vmov 2475754826  }
   0xc   :  { %293 = vperm.xlu0 %2942, %v273_v13   ;;  %2837 = vmatpush3.bf16.msra.mxu0 %v2948_v17  ;;  %v425_v39 = vshrl.u32 %v424_v37, 23  ;;  %v22_v45 = vld [vmem:[%s4659_s0 + $0x8] sm:$0xff]  ;;  %v171_v49 = vmul.f32 %v42_v43, %v42_v43  ;;  %v428_v50 = vand.u32 8388607, %v421_v41  ;;  %v61_v52 = vmul.f32 %v21_v44, %v21_v44  ;;  %v23_v44 = vld [vmem:[%s4659_s0 + $0x10] sm:$0xff] }
   0xd   :  { %2838 = vmatprep.subr.bf16.mxu0 %v2949_v19  ;;  %2888 = vmatpush3.bf16.msra.mxu1 %v2948_v17  ;;  %v71_v53 = vmul.f32 %v22_v45, %v22_v45  ;;  %v528_v57 = vshrl.u32 %v527_v47, 23  ;;  %v172_v63 = vmul.f32 %v44_v55, %v44_v55  ;;  %v3045_v13 = vmov 920167782  }
   0xe   :  { %318 = vperm.xlu1 %2941, %v278_v16   ;;  %2881 = vmatprep.subr.bf16.mxu1 %v2949_v19  ;;  %v2736_v46 = vadd.s32 4294967169, %v425_v39  ;;  %v3188_v58 = vadd.f32 %v171_v49, %v161_v48  ;;  %v429_v59 = vor.u32 8388608, %v428_v50 }
   0xf   :  { %v3190_v61 = vadd.f32 %v71_v53, %v61_v52  ;;  %v3232_v54 = vadd.f32 %v172_v63, %v162_v62 }
  0x10   :  { %313 = vperm.xlu0 %2942, %v277_v18   ;;  %2839 = vmatpush3.bf16.msra.mxu0 %v2950_v20  ;;  %v431_v51 = vadd.s32 1, %v2736_v46  ;;  %2959 = vrsqrt.f32 %v3188_v58  ;;  %v469_v15 = vshll.u32 %v429_v59, 8  ;;  %vm193_vm11 = vcmp.eq.f32.partialorder %v3188_v58, inf }
  0x11   :  { %2840 = vmatprep.subr.bf16.mxu0 %v2951_v21  ;;  %2889 = vmatpush3.bf16.msra.mxu1 %v2950_v20  ;;  %2961 = vrsqrt.f32 %v3190_v61  ;;  %vm195_vm12 = vcmp.eq.f32.partialorder %v3188_v58, 0.0  ;;  %vm93_vm15 = vcmp.eq.f32.partialorder %v3190_v61, inf }
  0x12   :  { %358 = vperm.xlu1 %2941, %v264_v4   ;;  %2882 = vmatprep.subr.bf16.mxu1 %v2951_v21  ;;  %vm432_vm0 = vcmp.gt.s32.totalorder %v431_v51, 0  ;;  %v524_v4 = vand.u32 2147483647, %v3164_v40  ;;  %v3046_v21 = vmov 1326507024   ;;  %2963 = vrsqrt.f32 %v3232_v54 }
  0x13   :  { %v433_v56 = vsel %vm432_vm0, %v431_v51, 0 }
  0x14   :  { %353 = vperm.xlu0 %2942, %v263_v6   ;;  %2841 = vmatpush3.bf16.msra.mxu0 %v2952_v23  ;;  %v435_v60 = vand.u32 31, %v433_v56  ;;  %v434_v0 = vshrl.u32 %v433_v56, 5  ;;  %v3234_v56 = vmul.f32 %v23_v44, %v23_v44 }
  0x15   :  { %2842 = vmatprep.subr.bf16.mxu0 %v2953_v24  ;;  %2890 = vmatpush3.bf16.msra.mxu1 %v2952_v23  ;;  %v531_v23 = vand.u32 8388607, %v524_v4 }
  0x16   :  { %378 = vperm.xlu1 %2941, %v268_v9   ;;  %2883 = vmatprep.subr.bf16.mxu1 %v2953_v24  ;;  %v436_v1 = vsub.s32 32, %v435_v60  ;;  %v438_v3 = vshll.u32 %v3041_v2, %v435_v60  ;;  %v441_v6 = vshll.u32 %v3042_v5, %v435_v60  ;;  %v444_v8 = vshll.u32 %v3043_v7, %v435_v60 }
  0x17   :  { %v3044_v9 = vmov 2102212464   ;;  %v450_v14 = vshll.u32 %v3045_v13, %v435_v60  ;;  %vm453_vm1 = vcmp.lt.s32.totalorder %v434_v0, 1  ;;  %vm454_vm2 = vcmp.lt.s32.totalorder %v434_v0, 2 }
  0x18   :  { %373 = vperm.xlu0 %2942, %v267_v11   ;;  %2843 = vmatpush3.bf16.msra.mxu0 %v2954_v28  ;;  %v447_v10 = vshll.u32 %v3044_v9, %v435_v60  ;;  %v2740_v11 = vadd.s32 4294967169, %v528_v57  ;;  %v439_v12 = vshrl.u32 %v3042_v5, %v436_v1  ;;  %v437_v16 = vshrl.u32 %v3041_v2, %v436_v1 }
  0x19   :  { %2844 = vmatprep.subr.bf16.mxu0 %v2955_v30  ;;  %2891 = vmatpush3.bf16.msra.mxu1 %v2954_v28  ;;  %v442_v17 = vshrl.u32 %v3043_v7, %v436_v1  ;;  %v445_v18 = vshrl.u32 %v3044_v9, %v436_v1  ;;  %v448_v19 = vshrl.u32 %v3045_v13, %v436_v1  ;;  %vm455_vm3 = vcmp.lt.s32.totalorder %v434_v0, 3 }
  0x1a   :  { %308 = vperm.xlu1 %2941, %v276_v26   ;;  %2884 = vmatprep.subr.bf16.mxu1 %v2955_v30  ;;  %v440_v20 = vor.u32 %v439_v12, %v438_v3  ;;  %vm456_vm4 = vcmp.lt.s32.totalorder %v434_v0, 4  ;;  %v532_v43 = vor.u32 8388608, %v531_v23  ;;  %v3229_v53 = vpop.eup %2959 }
  0x1b   :  { %v443_v24 = vor.u32 %v442_v17, %v441_v6  ;;  %v449_v26 = vor.u32 %v448_v19, %v447_v10 }
  0x1c   :  { %303 = vperm.xlu0 %2942, %v275_v29   ;;  %2845 = vmatpush3.bf16.msra.mxu0 %v2956_v33  ;;  %v457_v29 = vsel %vm453_vm1, %v437_v16, %v440_v20  ;;  %v3236_v60 = vshll.u32 %v532_v43, 8 }
  0x1d   :  { %2846 = vmatprep.subr.bf16.mxu0 %v2957_v36  ;;  %2892 = vmatpush3.bf16.msra.mxu1 %v2956_v33 }
  0x1e   :  { %328 = vperm.xlu1 %2941, %v280_v32   ;;  %2885 = vmatprep.subr.bf16.mxu1 %v2957_v36  ;;  %v462_v32 = vsel %vm456_vm4, %v449_v26, 920167782 }
  0x20   :  { %323 = vperm.xlu0 %2942, %v279_v35   ;;  %2847 = vmatpush3.bf16.msra.mxu0 %v2958_v38 }
  0x21   :  { %2893 = vmatpush3.bf16.msra.mxu1 %v2958_v38  ;;  %v3213_v38 = vld [vmem:[%s4657_s3 + $0x18] sm:$0xff] }
  0x22   :  { %368 = vperm.xlu1 %2941, %v266_v22   ;;  %v451_v22 = vshrl.u32 %v3046_v21, %v436_v1  ;;  %v733_v52 = vand.u32 2139095040, %v3213_v38 }
  0x24   :  { %363 = vperm.xlu0 %2942, %v265_v25   ;;  %v446_v25 = vor.u32 %v445_v18, %v444_v8  ;;  %v452_v28 = vor.u32 %v451_v22, %v450_v14  ;;  %v734_v8 = vshrl.u32 %v733_v52, 23 }
  0x26   :  { %388 = vperm.xlu1 %2941, %v270_v27   ;;  %v534_v27 = vadd.s32 1, %v2740_v11  ;;  %v458_v30 = vsel %vm456_vm4, %v446_v25, 2102212464  ;;  %v463_v35 = vsel %vm455_vm3, %v446_v25, %v462_v32  ;;  %v465_v36 = vsel %vm453_vm1, %v443_v24, %v446_v25 }
  0x27   :  { %v459_v33 = vsel %vm455_vm3, %v443_v24, %v458_v30  ;;  %v466_v37 = vsel %vm456_vm4, %v452_v28, 1326507024  ;;  %v28_v30 = vld [vmem:[%s4659_s0 + $0x38] sm:$0xff] }
  0x28   :  { %383 = vperm.xlu0 %2942, %v269_v31   ;;  %v461_v31 = vsel %vm453_vm1, %v440_v20, %v443_v24  ;;  %v467_v42 = vsel %vm455_vm3, %v449_v26, %v466_v37  ;;  %vm535_vm5 = vcmp.gt.s32.totalorder %v534_v27, 0  ;;  %v460_v45 = vsel %vm454_vm2, %v457_v29, %v459_v33  ;;  %v24_v26 = vld [vmem:[%s4659_s0 + $0x18] sm:$0xff] }
  0x29   :  { %v464_v39 = vsel %vm454_vm2, %v461_v31, %v463_v35  ;;  %v468_v46 = vsel %vm454_vm2, %v465_v36, %v467_v42  ;;  %v536_v51 = vsel %vm535_vm5, %v534_v27, 0  ;;  %v476_v57 = vmul.u32 %v469_v15, %v460_v45  ;;  %v27_v27 = vld [vmem:[%s4659_s0 + $0x30] sm:$0xff]  ;;  %v3266_v36 = vpop.eup %2961 }
  0x2a   :  { %v3221_v47 = vmul.u32.u64.low %v469_v15, %v464_v39  ;;  %v3222_v48 = vmul.u32.u64.high %v469_v15, %v464_v39, %v3221_v47  ;;  %v3225_v49 = vmul.u32.u64.low %v469_v15, %v468_v46  ;;  %v3226_v50 = vmul.u32.u64.high %v469_v15, %v468_v46, %v3225_v49  ;;  %v25_v46 = vld [vmem:[%s4659_s0 + $0x20] sm:$0xff] }
  0x2b   :  { %v538_v55 = vand.u32 31, %v536_v51  ;;  %v537_v59 = vshrl.u32 %v536_v51, 5  ;;  %v72_v44 = vmul.f32 %v24_v26, %v24_v26  ;;  %v64_v45 = vmul.f32 %v27_v27, %v27_v27  ;;  %v34_v26 = vld [vmem:[%s4659_s0 + $0x68] sm:$0xff] }
  0x2c   :  { %v479_v0 = vadd.s32 1, %v3222_v48  ;;  %vm478_vm6 = vc.u32 %v3226_v50, %v3221_v47  ;;  %v74_v52 = vmul.f32 %v28_v30, %v28_v30  ;;  %vm423_vm1 = vcmp.lt.s32.totalorder %v3152_v34, 0 }
  0x2d   :  { %v539_v1 = vsub.s32 32, %v538_v55  ;;  %v541_v3 = vshll.u32 %v3041_v2, %v538_v55  ;;  %v544_v6 = vshll.u32 %v3042_v5, %v538_v55  ;;  %v547_v62 = vshll.u32 %v3043_v7, %v538_v55 }
  0x2e   :  { %v550_v63 = vshll.u32 %v3044_v9, %v538_v55  ;;  %v480_v10 = vsel %vm478_vm6, %v479_v0, %v3222_v48  ;;  %v553_v18 = vshll.u32 %v3045_v13, %v538_v55  ;;  %vm556_vm7 = vcmp.lt.s32.totalorder %v537_v59, 1  ;;  %v26_v48 = vld [vmem:[%s4659_s0 + $0x28] sm:$0xff] }
  0x2f   :  { %v540_v11 = vshrl.u32 %v3041_v2, %v539_v1  ;;  %v542_v12 = vshrl.u32 %v3042_v5, %v539_v1  ;;  %v545_v14 = vshrl.u32 %v3043_v7, %v539_v1  ;;  %v481_v15 = vadd.s32 %v480_v10, %v476_v57 }
  0x30   :  { %v548_v16 = vshrl.u32 %v3044_v9, %v539_v1  ;;  %v551_v17 = vshrl.u32 %v3045_v13, %v539_v1  ;;  %v554_v22 = vshrl.u32 %v3046_v21, %v539_v1  ;;  %vm557_vm8 = vcmp.lt.s32.totalorder %v537_v59, 2 }
  0x31   :  { %v543_v19 = vor.u32 %v542_v12, %v541_v3  ;;  %v546_v20 = vor.u32 %v545_v14, %v544_v6  ;;  %v482_v23 = vadd.s32 536870912, %v481_v15  ;;  %vm558_vm9 = vcmp.lt.s32.totalorder %v537_v59, 3 }
  0x32   :  { %v549_v24 = vor.u32 %v548_v16, %v547_v62  ;;  %v552_v25 = vor.u32 %v551_v17, %v550_v63  ;;  %v555_v28 = vor.u32 %v554_v22, %v553_v18  ;;  %vm559_vm10 = vcmp.lt.s32.totalorder %v537_v59, 4 }
  0x33   :  { %v560_v29 = vsel %vm556_vm7, %v540_v11, %v543_v19  ;;  %v3263_v31 = vshrl.u32 %v482_v23, 30  ;;  %v564_v33 = vsel %vm556_vm7, %v543_v19, %v546_v20  ;;  %v2748_v62 = vadd.s32 4294967169, %v734_v8 }
  0x34   :  { %v561_v32 = vsel %vm559_vm10, %v549_v24, 2102212464  ;;  %v565_v35 = vsel %vm559_vm10, %v552_v25, 920167782  ;;  %v568_v42 = vsel %vm556_vm7, %v546_v20, %v549_v24  ;;  %v569_v43 = vsel %vm559_vm10, %v555_v28, 1326507024 }
  0x35   :  { %v562_v37 = vsel %vm558_vm9, %v546_v20, %v561_v32  ;;  %v566_v39 = vsel %vm558_vm9, %v549_v24, %v565_v35  ;;  %v484_v49 = vshll.u32 %v3263_v31, 30  ;;  %v570_v55 = vsel %vm558_vm9, %v552_v25, %v569_v43  ;;  %v35_v20 = vld [vmem:[%s4659_s0 + $0x70] sm:$0xff]  ;;  %v33_v25 = vld [vmem:[%s4659_s0 + $0x60] sm:$0xff] }
  0x36   :  { %v567_v51 = vsel %vm557_vm8, %v564_v33, %v566_v39  ;;  %v563_v3 = vsel %vm557_vm8, %v560_v29, %v562_v37  ;;  %v571_v6 = vsel %vm557_vm8, %v568_v42, %v570_v55  ;;  %v63_v63 = vmul.f32 %v25_v46, %v25_v46 }
  0x37   :  { %v3281_v57 = vmul.u32.u64.low %v3236_v60, %v567_v51  ;;  %v3282_v0 = vmul.u32.u64.high %v3236_v60, %v567_v51, %v3281_v57  ;;  %v3285_v1 = vsub.s32 %v481_v15, %v484_v49  ;;  %v73_v10 = vmul.f32 %v26_v48, %v26_v48 }
  0x38   :  { %v3290_v11 = vmul.u32.u64.low %v3236_v60, %v571_v6  ;;  %v3291_v12 = vmul.u32.u64.high %v3236_v60, %v571_v6, %v3290_v11  ;;  %v740_v16 = vadd.s32 1, %v2748_v62  ;;  %v196_v15 = vand.u32 2147483648, %v3188_v58 }
  0x39   :  { %v487_v14 = vsub.s32 0, %v3285_v1  ;;  %v3298_v17 = vadd.f32 %v72_v44, %v3234_v56  ;;  %v579_v59 = vmul.u32 %v3236_v60, %v563_v3  ;;  %v582_v8 = vadd.s32 1, %v3282_v0  ;;  %v36_v60 = vld [vmem:[%s4659_s0 + $0x78] sm:$0xff] }
  0x3a   :  { %v96_v18 = vand.u32 2147483648, %v3190_v61  ;;  %v3304_v19 = vadd.f32 %v74_v52, %v64_v45  ;;  %v203_v23 = vand.u32 2147483648, %v3232_v54  ;;  %v3311_v56 = vadd.f32 %v73_v10, %v63_v63 }
  0x3b   :  { %v2737_v22 = vmin.u32 %v487_v14, %v3285_v1  ;;  %vm581_vm13 = vc.u32 %v3291_v12, %v3281_v57  ;;  %vm741_vm14 = vcmp.gt.s32.totalorder %v740_v16, 0  ;;  %v192_v24 = vmul.f32 %v3229_v53, %v3188_v58 }
  0x3c   :  { %v583_v28 = vsel %vm581_vm13, %v582_v8, %v3282_v0  ;;  %v742_v29 = vsel %vm741_vm14, %v740_v16, 0  ;;  %2965 = vrsqrt.f32 %v3298_v17  ;;  %v103_v30 = vand.u32 2147483648, %v3298_v17 }
  0x3d   :  { %v489_v27 = vclz %v2737_v22  ;;  %v68_v32 = vmul.f32 %v35_v20, %v35_v20  ;;  %v584_v33 = vadd.s32 %v583_v28, %v579_v59  ;;  %2967 = vrsqrt.f32 %v3304_v19 }
  0x3e   :  { %v78_v53 = vmul.f32 %v36_v60, %v36_v60  ;;  %v744_v37 = vand.u32 31, %v742_v29  ;;  %v67_v39 = vmul.f32 %v33_v25, %v33_v25  ;;  %v77_v42 = vmul.f32 %v34_v26, %v34_v26 }
  0x3f   :  { %v2738_v35 = vadd.s32 4294967294, %v489_v27  ;;  %v585_v43 = vadd.s32 536870912, %v584_v33  ;;  %v730_v44 = vand.u32 2147483647, %v3213_v38  ;;  %v194_v45 = vsel %vm193_vm11, %v3188_v58, %v192_v24 }
  0x40   :  { %2969 = vrsqrt.f32 %v3311_v56  ;;  %v477_v46 = vadd.s32 %v3221_v47, %v3226_v50  ;;  %v92_v48 = vmul.f32 %v3266_v36, %v3190_v61  ;;  %v745_v52 = vsub.s32 32, %v744_v37  ;;  %v3354_v36 = vpop.eup %2963 }
  0x41   :  { %vm2739_vm0 = vcmp.lt.s32.totalorder %v2738_v35, 0  ;;  %v3340_v51 = vshrl.u32 %v585_v43, 30  ;;  %v3342_v55 = vadd.f32 %v78_v53, %v68_v32  ;;  %v3347_v62 = vsel %vm195_vm12, %v196_v15, %v194_v45 }
  0x42   :  { %v492_v49 = vsel %vm2739_vm0, 0, %v2738_v35  ;;  %v3349_v63 = vadd.f32 %v77_v42, %v67_v39  ;;  %v737_v50 = vand.u32 8388607, %v730_v44  ;;  %v3356_v14 = vshrl.u32 %v742_v29, 5 }
  0x43   :  { %v493_v0 = vsub.s32 32, %v492_v49  ;;  %v494_v3 = vshll.u32 %v3285_v1, %v492_v49  ;;  %v497_v6 = vsub.s32 4294967266, %v492_v49  ;;  %v587_v47 = vshll.u32 %v3340_v51, 30 }
  0x44   :  { %v747_v1 = vshll.u32 %v3041_v2, %v744_v37  ;;  %v748_v58 = vshrl.u32 %v3042_v5, %v745_v52  ;;  %v750_v15 = vshll.u32 %v3042_v5, %v744_v37  ;;  %v751_v59 = vshrl.u32 %v3043_v7, %v745_v52 }
  0x45   :  { %v495_v10 = vshrl.u32 %v477_v46, %v493_v0  ;;  %v498_v11 = vadd.s32 127, %v497_v6  ;;  %v3359_v16 = vsub.s32 %v584_v33, %v587_v47  ;;  %v756_v22 = vshll.u32 %v3044_v9, %v744_v37 }
  0x46   :  { %v757_v60 = vshrl.u32 %v3045_v13, %v745_v52  ;;  %v3367_v24 = vpop.eup %2965  ;;  %v738_v26 = vor.u32 8388608, %v737_v50  ;;  %v753_v27 = vshll.u32 %v3043_v7, %v744_v37  ;;  %v754_v28 = vshrl.u32 %v3044_v9, %v745_v52 }
  0x47   :  { %v496_v8 = vor.u32 %v495_v10, %v494_v3  ;;  %v499_v20 = vshll.u32 %v498_v11, 23  ;;  %v590_v25 = vsub.s32 0, %v3359_v16  ;;  %v3372_v29 = vpop.eup %2967  ;;  %v759_v53 = vshll.u32 %v3045_v13, %v744_v37 }
  0x48   :  { %v760_v35 = vshrl.u32 %v3046_v21, %v745_v52  ;;  %v3379_v39 = vsel %vm93_vm15, %v3190_v61, %v92_v48  ;;  %vm3383_vm2 = vcmp.le.f32.partialorder %v421_v41, 0.7853982  ;;  %v749_v45 = vor.u32 %v748_v58, %v747_v1 }
  0x49   :  { %v500_v32 = vor.u32 4788187, %v499_v20  ;;  %v503_v33 = vcvt.s32.f32 %v496_v8  ;;  %v2741_v43 = vmin.u32 %v590_v25, %v3359_v16  ;;  %v752_v46 = vor.u32 %v751_v59, %v750_v15 }
  0x4a   :  { %v3388_v49 = vpop.eup %2969  ;;  %v746_v0 = vshrl.u32 %v3041_v2, %v745_v52  ;;  %v758_v3 = vor.u32 %v757_v60, %v756_v22  ;;  %vm762_vm3 = vcmp.lt.s32.totalorder %v3356_v14, 1  ;;  %v755_v6 = vor.u32 %v754_v28, %v753_v27 }
  0x4b   :  { %v501_v37 = vand.u32 2147483647, %v500_v32  ;;  %v592_v48 = vclz %v2741_v43  ;;  %v761_v47 = vor.u32 %v760_v35, %v759_v53  ;;  %vm765_vm4 = vcmp.lt.s32.totalorder %v3356_v14, 4  ;;  %v3426_v53 = vld [vmem:[%s4657_s3 + $0x10] sm:$0xff] }
  0x4c   :  { %v507_v50 = vsub.s32 4, %v3263_v31  ;;  %vm764_vm5 = vcmp.lt.s32.totalorder %v3356_v14, 3  ;;  %v778_v10 = vshll.u32 %v738_v26, 8  ;;  %vm763_vm6 = vcmp.lt.s32.totalorder %v3356_v14, 2 }
  0x4d   :  { %v504_v41 = vmul.f32 %v503_v33, %v501_v37  ;;  %v2742_v11 = vadd.s32 4294967294, %v592_v48  ;;  %v767_v52 = vsel %vm765_vm4, %v755_v6, 2102212464  ;;  %v770_v1 = vsel %vm762_vm3, %v749_v45, %v752_v46 }
  0x4e   :  { %vm95_vm7 = vcmp.eq.f32.partialorder %v3190_v61, 0.0  ;;  %v580_v15 = vadd.s32 %v3281_v57, %v3291_v12  ;;  %v766_v59 = vsel %vm762_vm3, %v746_v0, %v749_v45  ;;  %v771_v8 = vsel %vm765_vm4, %v758_v3, 920167782 }
  0x4f   :  { %v505_v58 = vxor.u32 2147483648, %v504_v41  ;;  %vm2743_vm8 = vcmp.lt.s32.totalorder %v2742_v11, 0  ;;  %v772_v20 = vsel %vm764_vm5, %v755_v6, %v771_v8  ;;  %v774_v22 = vsel %vm762_vm3, %v752_v46, %v755_v6 }
  0x50   :  { %v775_v60 = vsel %vm765_vm4, %v761_v47, 1326507024  ;;  %vm200_vm9 = vcmp.eq.f32.partialorder %v3232_v54, inf  ;;  %v595_v25 = vsel %vm2743_vm8, 0, %v2742_v11  ;;  %v768_v57 = vsel %vm764_vm5, %v752_v46, %v767_v52 }
  0x51   :  { %v773_v12 = vsel %vm763_vm6, %v770_v1, %v772_v20  ;;  %v776_v26 = vsel %vm764_vm5, %v758_v3, %v775_v60  ;;  %v506_v27 = vsel %vm423_vm1, %v505_v58, %v504_v41  ;;  %v596_v28 = vsub.s32 32, %v595_v25 }
  0x52   :  { %v597_v32 = vshll.u32 %v3359_v16, %v595_v25  ;;  %v600_v33 = vsub.s32 4294967266, %v595_v25  ;;  %2971 = vrsqrt.f32 %v3342_v55  ;;  %v777_v35 = vsel %vm763_vm6, %v774_v22, %v776_v26 }
  0x53   :  { %v3431_v43 = vmul.u32.u64.low %v778_v10, %v773_v12  ;;  %v3432_v45 = vmul.u32.u64.high %v778_v10, %v773_v12, %v3431_v43  ;;  %v598_v46 = vshrl.u32 %v580_v15, %v596_v28  ;;  %v610_v0 = vsub.s32 4, %v3340_v51  ;;  %v48_v12 = vld [vmem:[%s4658_s1 + $0x38] sm:$0xff] }
  0x54   :  { %v601_v37 = vadd.s32 127, %v600_v33  ;;  %v769_v16 = vsel %vm763_vm6, %v766_v59, %v768_v57  ;;  %vm202_vm10 = vcmp.eq.f32.partialorder %v3232_v54, 0.0  ;;  %v509_v3 = vsel %vm3383_vm2, %v3152_v34, %v506_v27 }
  0x55   :  { %v3442_v48 = vmul.u32.u64.low %v778_v10, %v777_v35  ;;  %v3443_v6 = vmul.u32.u64.high %v778_v10, %v777_v35, %v3442_v48  ;;  %v630_v47 = vand.u32 2139095040, %v3426_v53  ;;  %v199_v41 = vmul.f32 %v3354_v36, %v3232_v54 }
  0x56   :  { %vm100_vm11 = vcmp.eq.f32.partialorder %v3298_v17, inf  ;;  %v508_v14 = vsel %vm423_vm1, %v507_v50, %v3263_v31  ;;  %v599_v11 = vor.u32 %v598_v46, %v597_v32  ;;  %v602_v52 = vshll.u32 %v601_v37, 23 }
  0x57   :  { %vm526_vm12 = vcmp.lt.s32.totalorder %v3164_v40, 0  ;;  %v785_v1 = vmul.u32 %v778_v10, %v769_v16  ;;  %v788_v58 = vadd.s32 1, %v3432_v45  ;;  %v631_v15 = vshrl.u32 %v630_v47, 23 }
  0x58   :  { %2973 = vcosq.f32 %v509_v3  ;;  %v603_v59 = vor.u32 4788187, %v602_v52  ;;  %v606_v8 = vcvt.s32.f32 %v599_v11  ;;  %v611_v36 = vsel %vm526_vm12, %v610_v0, %v3340_v51 }
  0x59   :  { %v510_v20 = vsel %vm3383_vm2, 0, %v508_v14  ;;  %2975 = vsinq.f32 %v509_v3  ;;  %vm787_vm13 = vc.u32 %v3443_v6, %v3431_v43  ;;  %v2744_v31 = vadd.s32 4294967169, %v631_v15 }
  0x5a   :  { %v3466_v50 = vsel %vm95_vm7, %v96_v18, %v3379_v39  ;;  %vm3470_vm14 = vcmp.le.f32.partialorder %v524_v4, 0.7853982  ;;  %v604_v51 = vand.u32 2147483647, %v603_v59  ;;  %v789_v42 = vsel %vm787_vm13, %v788_v58, %v3432_v45  ;;  %v47_v39 = vld [vmem:[%s4658_s1 + $0x30] sm:$0xff] }
  0x5b   :  { %v145_v22 = vand.u32 2147483648, %v3342_v55  ;;  %v613_v60 = vsel %vm3470_vm14, 0, %v611_v36  ;;  %v790_v25 = vadd.s32 %v789_v42, %v785_v1  ;;  %v637_v57 = vadd.s32 1, %v2744_v31 }
  0x5c   :  { %v201_v61 = vsel %vm200_vm9, %v3232_v54, %v199_v41  ;;  %2977 = vrsqrt.f32 %v3349_v63  ;;  %v607_v4 = vmul.f32 %v606_v8, %v604_v51  ;;  %v1554_v18 = vadd.s32 3, %v510_v20  ;;  %v2972_v26 = vpop.eup %2971 }
  0x5d   :  { %v99_v27 = vmul.f32 %v3367_v24, %v3298_v17  ;;  %v791_v28 = vadd.s32 536870912, %v790_v25  ;;  %v627_v32 = vand.u32 2147483647, %v3426_v53  ;;  %vm638_vm15 = vcmp.gt.s32.totalorder %v637_v57, 0 }
  0x5e   :  { %v138_v33 = vand.u32 2147483648, %v3349_v63  ;;  %v608_v35 = vxor.u32 2147483648, %v607_v4  ;;  %v1658_v45 = vadd.s32 3, %v613_v60  ;;  %v639_v46 = vsel %vm638_vm15, %v637_v57, 0 }
  0x5f   :  { %v3492_v37 = vand.u32 3, %v510_v20  ;;  %v3494_v0 = vshrl.u32 %v791_v28, 30  ;;  %v164_v16 = vmul.f32 %v47_v39, %v47_v39  ;;  %v174_v3 = vmul.f32 %v48_v12, %v48_v12 }
  0x60   :  { %v3500_v24 = vsel %vm202_vm10, %v203_v23, %v201_v61  ;;  %v609_v48 = vsel %vm526_vm12, %v608_v35, %v607_v4  ;;  %v3504_v47 = vand.u32 3, %v1554_v18  ;;  %v641_v41 = vand.u32 31, %v639_v46 }
  0x61   :  { %v3509_v14 = vsel %vm100_vm11, %v3298_v17, %v99_v27  ;;  %v612_v11 = vsel %vm3470_vm14, %v3164_v40, %v609_v48  ;;  %v793_v52 = vshll.u32 %v3494_v0, 30  ;;  %v634_v54 = vand.u32 8388607, %v627_v32 }
  0x62   :  { %v2974_v23 = vpop.eup %2973  ;;  %v3518_v1 = vmul.f32 %v2972_v26, %v3342_v55  ;;  %2979 = vcosq.f32 %v612_v11  ;;  %v3520_v58 = vand.u32 3, %v613_v60  ;;  %v3522_v15 = vand.u32 3, %v1658_v45 }
  0x63   :  { %v2976_v59 = vpop.eup %2975  ;;  %vm515_vm0 = vcmp.lt.s32.totalorder %v3492_v37, 2  ;;  %2981 = vsinq.f32 %v612_v11  ;;  %v3525_v8 = vsub.s32 %v790_v25, %v793_v52  ;;  %v3527_v36 = vadd.f32 %v174_v3, %v164_v16 }
  0x64   :  { %vm516_vm1 = vcmp.eq.s32.totalorder %v3492_v37, 0  ;;  %vm519_vm2 = vcmp.eq.s32.totalorder %v3492_v37, 2  ;;  %vm1557_vm3 = vcmp.eq.s32.totalorder %v3504_v47, 0  ;;  %v642_v20 = vsub.s32 32, %v641_v41 }
  0x65   :  { %v520_v31 = vxor.u32 2147483648, %v2974_v23  ;;  %vm1560_vm4 = vcmp.eq.s32.totalorder %v3504_v47, 2  ;;  %v796_v10 = vsub.s32 0, %v3525_v8  ;;  %v635_v51 = vor.u32 8388608, %v634_v54 }
  0x66   :  { %v3534_v42 = vpop.eup %2977  ;;  %v517_v60 = vxor.u32 2147483648, %v2976_v59  ;;  %vm622_vm5 = vcmp.eq.s32.totalorder %v3520_v58, 2  ;;  %vm1664_vm6 = vcmp.eq.s32.totalorder %v3522_v15, 2  ;;  %v3538_v25 = vshrl.u32 %v639_v46, 5 }
  0x67   :  { %v644_v57 = vshll.u32 %v3041_v2, %v641_v41  ;;  %vm619_vm7 = vcmp.eq.s32.totalorder %v3520_v58, 0  ;;  %vm1661_vm8 = vcmp.eq.s32.totalorder %v3522_v15, 0  ;;  %v2749_v61 = vmin.u32 %v796_v10, %v3525_v8 }
  0x68   :  { %v647_v4 = vshll.u32 %v3042_v5, %v641_v41  ;;  %v650_v18 = vshll.u32 %v3043_v7, %v641_v41  ;;  %v651_v39 = vshrl.u32 %v3044_v9, %v642_v20  ;;  %v645_v12 = vshrl.u32 %v3042_v5, %v642_v20 }
  0x69   :  { %v648_v26 = vshrl.u32 %v3043_v7, %v642_v20  ;;  %v653_v27 = vshll.u32 %v3044_v9, %v641_v41  ;;  %v654_v28 = vshrl.u32 %v3045_v13, %v642_v20  ;;  %v521_v35 = vsel %vm519_vm2, %v520_v31, %v2976_v59 }
  0x6a   :  { %v786_v45 = vadd.s32 %v3431_v43, %v3443_v6  ;;  %v798_v46 = vclz %v2749_v61  ;;  %v3555_v16 = vshll.u32 %v635_v51, 8  ;;  %v518_v3 = vsel %vm516_vm1, %v2974_v23, %v517_v60 }
  0x6b   :  { %v3561_v48 = vsel %vm1557_vm3, %v2974_v23, %v517_v60  ;;  %v3565_v11 = vsel %vm1560_vm4, %v520_v31, %v2976_v59  ;;  %v643_v52 = vshrl.u32 %v3041_v2, %v642_v20  ;;  %v652_v10 = vor.u32 %v651_v39, %v650_v18 }
  0x6c   :  { %v2750_v54 = vadd.s32 4294967294, %v798_v46  ;;  %v656_v43 = vshll.u32 %v3045_v13, %v641_v41  ;;  %v657_v6 = vshrl.u32 %v3046_v21, %v642_v20  ;;  %v2980_v51 = vpop.eup %2979  ;;  %vm102_vm9 = vcmp.eq.f32.partialorder %v3298_v17, 0.0 }
  0x6d   :  { %vm142_vm10 = vcmp.eq.f32.partialorder %v3342_v55, inf  ;;  %v646_v61 = vor.u32 %v645_v12, %v644_v57  ;;  %v649_v23 = vor.u32 %v648_v26, %v647_v4  ;;  %v655_v60 = vor.u32 %v654_v28, %v653_v27  ;;  %v2982_v59 = vpop.eup %2981 }
  0x6e   :  { %vm662_vm11 = vcmp.lt.s32.totalorder %v3538_v25, 4  ;;  %vm618_vm12 = vcmp.lt.s32.totalorder %v3520_v58, 2  ;;  %v623_v31 = vxor.u32 2147483648, %v2980_v51  ;;  %vm1556_vm13 = vcmp.lt.s32.totalorder %v3504_v47, 2 }
  0x6f   :  { %vm2751_vm15 = vcmp.lt.s32.totalorder %v2750_v54, 0  ;;  %vm659_vm1 = vcmp.lt.s32.totalorder %v3538_v25, 1  ;;  %v664_v41 = vsel %vm662_vm11, %v652_v10, 2102212464  ;;  %vm513_vm2 = vweird.f32 %v3152_v34 }
  0x70   :  { %v522_v20 = vsel %vm515_vm0, %v518_v3, %v521_v35  ;;  %v620_v57 = vxor.u32 2147483648, %v2982_v59  ;;  %v801_v4 = vsel %vm2751_vm15, 0, %v2750_v54  ;;  %vm660_vm3 = vcmp.lt.s32.totalorder %v3538_v25, 2 }
  0x71   :  { %v802_v18 = vsub.s32 32, %v801_v4  ;;  %v803_v39 = vshll.u32 %v3525_v8, %v801_v4  ;;  %v658_v12 = vor.u32 %v657_v6, %v656_v43  ;;  %vm661_vm4 = vcmp.lt.s32.totalorder %v3538_v25, 3 }
  0x72   :  { %vm616_vm14 = vweird.f32 %v3164_v40  ;;  %v806_v26 = vsub.s32 4294967266, %v801_v4  ;;  %v663_v27 = vsel %vm659_vm1, %v643_v52, %v646_v61  ;;  %v665_v37 = vsel %vm661_vm4, %v649_v23, %v664_v41 }
  0x73   :  { %v667_v28 = vsel %vm659_vm1, %v646_v61, %v649_v23  ;;  %vm144_vm0 = vcmp.eq.f32.partialorder %v3342_v55, 0.0  ;;  %vm135_vm15 = vcmp.eq.f32.partialorder %v3349_v63, inf  ;;  %v624_v8 = vsel %vm622_vm5, %v623_v31, %v2982_v59 }
  0x74   :  { %v1666_v35 = vsel %vm1664_vm6, %v623_v31, %v2982_v59  ;;  %v804_v46 = vshrl.u32 %v786_v45, %v802_v18  ;;  %v668_v3 = vsel %vm662_vm11, %v655_v60, 920167782  ;;  %v621_v52 = vsel %vm619_vm7, %v2980_v51, %v620_v57 }
  0x75   :  { %v1663_v54 = vsel %vm1661_vm8, %v2980_v51, %v620_v57  ;;  %v807_v43 = vadd.s32 127, %v806_v26  ;;  %v669_v6 = vsel %vm661_vm4, %v652_v10, %v668_v3  ;;  %v671_v45 = vsel %vm659_vm1, %v649_v23, %v652_v10 }
  0x76   :  { %v805_v41 = vor.u32 %v804_v46, %v803_v39  ;;  %v670_v4 = vsel %vm660_vm3, %v667_v28, %v669_v6  ;;  %v672_v59 = vsel %vm662_vm11, %v658_v12, 1326507024  ;;  %vm137_vm5 = vcmp.eq.f32.partialorder %v3349_v63, 0.0 }
  0x77   :  { %v808_v51 = vshll.u32 %v807_v43, 23  ;;  %v666_v57 = vsel %vm660_vm3, %v663_v27, %v665_v37  ;;  %v673_v18 = vsel %vm661_vm4, %v655_v60, %v672_v59  ;;  %v104_v25 = vsel %vm102_vm9, %v103_v30, %v3509_v14 }
  0x78   :  { %v812_v26 = vcvt.s32.f32 %v805_v41  ;;  %v674_v28 = vsel %vm660_vm3, %v671_v45, %v673_v18  ;;  %v3621_v10 = vmul.u32.u64.low %v3555_v16, %v670_v4  ;;  %v3622_v23 = vmul.u32.u64.high %v3555_v16, %v670_v4, %v3621_v10 }
  0x79   :  { %v809_v12 = vor.u32 4788187, %v808_v51  ;;  %v3627_v46 = vmul.u32.u64.low %v3555_v16, %v674_v28  ;;  %v3628_v3 = vmul.u32.u64.high %v3555_v16, %v674_v28, %v3627_v46  ;;  %v143_v60 = vsel %vm142_vm10, %v3342_v55, %v3518_v1 }
  0x7a   :  { %vm732_vm6 = vcmp.lt.s32.totalorder %v3213_v38, 0  ;;  %v625_v37 = vsel %vm618_vm12, %v621_v52, %v624_v8  ;;  %v1563_v43 = vsel %vm1556_vm13, %v3561_v48, %v3565_v11  ;;  %vm4665_vm7 = vcmp.lt.s32.totalorder %v3522_v15, 2  ;;  %v45_v15 = vld [vmem:[%s4658_s1 + $0x20] sm:$0xff]  ;;  %v46_v48 = vld [vmem:[%s4658_s1 + $0x28] sm:$0xff] }
  0x7b   :  { %v1667_v17 = vsel %vm4665_vm7, %v1663_v54, %v1666_v35  ;;  %v810_v30 = vand.u32 2147483647, %v809_v12  ;;  %v523_v1 = vsel %vm513_vm2, nan, %v522_v20  ;;  %2983 = vrsqrt.f32 %v3527_v36 }
  0x7c   :  { %v685_v58 = vadd.s32 1, %v3622_v23  ;;  %v1564_v20 = vsel %vm513_vm2, nan, %v1563_v43  ;;  %vm684_vm8 = vc.u32 %v3628_v3, %v3621_v10  ;;  %v146_v54 = vsel %vm144_vm0, %v145_v22, %v143_v60 }
  0x7d   :  { %v813_v47 = vmul.f32 %v812_v26, %v810_v30  ;;  %v163_v45 = vmul.f32 %v45_v15, %v45_v15  ;;  %v173_v59 = vmul.f32 %v46_v48, %v46_v48  ;;  %vm3690_vm9 = vcmp.le.f32.partialorder %v730_v44, 0.7853982  ;;  %v55_v15 = vld [vmem:[%s4658_s1 + $0x70] sm:$0xff] }
  0x7e   :  { %v686_v41 = vsel %vm684_vm8, %v685_v58, %v3622_v23  ;;  %v113_v43 = vmul.f32 %v3372_v29, %v3304_v19  ;;  %vm114_vm10 = vcmp.eq.f32.partialorder %v3304_v19, inf  ;;  %vm107_vm11 = vcmp.eq.f32.partialorder %v3311_v56, inf }
  0x7f   :  { %v814_v4 = vxor.u32 2147483648, %v813_v47  ;;  %vm214_vm12 = vcmp.eq.f32.partialorder %v3527_v36, inf  ;;  %vm116_vm13 = vcmp.eq.f32.partialorder %v3304_v19, 0.0  ;;  %v117_v29 = vand.u32 2147483648, %v3304_v19 }
  0x80   :  { %v115_v58 = vsel %vm114_vm10, %v3304_v19, %v113_v43  ;;  %vm216_vm1 = vcmp.eq.f32.partialorder %v3527_v36, 0.0  ;;  %v56_v19 = vld [vmem:[%s4658_s1 + $0x78] sm:$0xff]  ;;  %vm629_vm2 = vcmp.lt.s32.totalorder %v3426_v53, 0  ;;  %vm3758_vm3 = vcmp.le.f32.partialorder %v627_v32, 0.7853982 }
  0x81   :  { %v344_v61 = vpop.permute.xlu1 %343  ;;  %v815_v46 = vsel %vm732_vm6, %v814_v4, %v813_v47  ;;  %v3740_v48 = vsel %vm116_vm13, %v117_v29, %v115_v58 }
  0x82   :  { %v391_v31 = vmul.f32 %v344_v61, %v3347_v62  ;;  %v818_v44 = vsel %vm3690_vm9, %v3213_v38, %v815_v46 }
  0x83   :  { %v284_v39 = vpop.permute.xlu0 %283 }
  0x84   :  { %v331_v62 = vmul.f32 %v284_v39, %v3466_v50  ;;  %v134_v50 = vmul.f32 %v3534_v42, %v3349_v63  ;;  %v682_v42 = vmul.u32 %v3555_v16, %v666_v57  ;;  %v626_v16 = vsel %vm616_vm14, nan, %v625_v37 }
  0x85   :  { %v349_v27 = vpop.permute.xlu1 %348 }
  0x86   :  { %v401_v8 = vadd.f32 %v391_v31, %v331_v62  ;;  %v392_v52 = vmul.f32 %v349_v27, %v3500_v24  ;;  %v1668_v24 = vsel %vm616_vm14, nan, %v1667_v17  ;;  %v136_v61 = vsel %vm135_vm15, %v3349_v63, %v134_v50 }
  0x87   :  { %v289_v14 = vpop.permute.xlu0 %288  ;;  %v687_v40 = vadd.s32 %v686_v41, %v682_v42  ;;  %v139_v55 = vsel %vm137_vm5, %v138_v33, %v136_v61  ;;  %v3700_v63 = vadd.f32 %v173_v59, %v163_v45  ;;  %v2984_v33 = vpop.eup %2983  ;;  %v816_v50 = vsub.s32 4, %v3494_v0  ;;  %v31_v61 = vld [vmem:[%s4659_s0 + $0x50] sm:$0xff] }
  0x88   :  { %v332_v6 = vmul.f32 %v289_v14, %v104_v25  ;;  %v2501_v31 = vmul.f32 %v1564_v20, %v401_v8  ;;  %v1451_v57 = vmul.f32 %v523_v1, %v401_v8  ;;  %v106_v17 = vmul.f32 %v3388_v49, %v3311_v56  ;;  %v53_v20 = vld [vmem:[%s4658_s1 + $0x60] sm:$0xff] }
  0x89   :  { %v3662_v11 = vpop.permute.xlu1 %298  ;;  %v688_v22 = vadd.s32 536870912, %v687_v40  ;;  %2985 = vrsqrt.f32 %v3700_v63  ;;  %v213_v30 = vmul.f32 %v2984_v33, %v3527_v36  ;;  %v817_v1 = vsel %vm732_vm6, %v816_v50, %v3494_v0 }
  0x8a   :  { %v402_v35 = vadd.f32 %v392_v52, %v332_v6  ;;  %2987 = vcosq.f32 %v818_v44  ;;  %v110_v49 = vand.u32 2147483648, %v3311_v56  ;;  %v108_v8 = vsel %vm107_vm11, %v3311_v56, %v106_v17 }
  0x8b   :  { %v3680_v34 = vpop.permute.xlu0 %293  ;;  %v3696_v27 = vshrl.u32 %v688_v22, 30  ;;  %2989 = vsinq.f32 %v818_v44  ;;  %vm109_vm14 = vcmp.eq.f32.partialorder %v3311_v56, 0.0  ;;  %v217_v52 = vand.u32 2147483648, %v3527_v36 }
  0x8c   :  { %v2502_v51 = vmul.f32 %v1668_v24, %v402_v35  ;;  %v1452_v18 = vmul.f32 %v626_v16, %v402_v35  ;;  %v819_v0 = vsel %vm3690_vm9, 0, %v817_v1  ;;  %v215_v6 = vsel %vm214_vm12, %v3527_v36, %v213_v30  ;;  %v54_v36 = vld [vmem:[%s4658_s1 + $0x68] sm:$0xff] }
  0x8d   :  { %v319_v39 = vpop.permute.xlu1 %318  ;;  %v690_v60 = vshll.u32 %v3696_v27, 30  ;;  %v3742_v56 = vsel %vm109_vm14, %v110_v49, %v108_v8  ;;  %v1866_v24 = vadd.s32 3, %v819_v0  ;;  %v218_v35 = vsel %vm216_vm1, %v217_v52, %v215_v6 }
  0x8e   :  { %v3686_v26 = vmul.f32 %v319_v39, %v146_v54  ;;  %v2512_v28 = vpack.c.bf16 %v2502_v51, %v2501_v31  ;;  %v2511_v23 = vpack.c.bf16 %v1452_v18, %v1451_v57  ;;  %v168_v54 = vmul.f32 %v55_v15, %v55_v15 }
  0x8f   :  { %v314_v62 = vpop.permute.xlu0 %313  ;;  %v3707_v37 = vsub.s32 %v687_v40, %v690_v60  ;;  %v3754_v41 = vand.u32 3, %v819_v0  ;;  %v683_v40 = vadd.s32 %v3621_v10, %v3628_v3  ;;  %v178_v45 = vmul.f32 %v56_v19, %v56_v19  ;;  %v3774_v3 = vld [vmem:[%s4657_s3 + $0x30] sm:$0xff] }
  0x90   :  { %v3698_v25 = vmul.f32 %v314_v62, %v139_v55  ;;  %2681 = vmatprep.mubr.bf16.mxu0 %v2512_v28  ;;  %v713_v51 = vsub.s32 4, %v3696_v27  ;;  %v167_v57 = vmul.f32 %v53_v20, %v53_v20  ;;  %v177_v18 = vmul.f32 %v54_v36, %v54_v36 }
  0x91   :  { %2682 = vmatmul.mubr.bf16.vlgmr.msra.gmra.mrb[0].mxu0 %v2511_v23  ;;  %v693_v14 = vsub.s32 0, %v3707_v37  ;;  %vm207_vm0 = vcmp.eq.f32.partialorder %v3700_v63, inf  ;;  %v3767_v32 = vmul.f32 %v31_v61, %v31_v61  ;;  %v1867_v23 = vand.u32 3, %v1866_v24  ;;  %v359_v30 = vpop.permute.xlu1 %358 }
  0x92   :  { %vm209_vm15 = vcmp.eq.f32.partialorder %v3700_v63, 0.0  ;;  %v210_v10 = vand.u32 2147483648, %v3700_v63  ;;  %vm824_vm5 = vcmp.lt.s32.totalorder %v3754_v41, 2  ;;  %v3778_v33 = vadd.f32 %v178_v45, %v168_v54 }
  0x93   :  { %v2745_v42 = vmin.u32 %v693_v14, %v3707_v37  ;;  %v2986_v59 = vpop.eup %2985  ;;  %vm822_vm6 = vweird.f32 %v3213_v38  ;;  %vm825_vm7 = vcmp.eq.s32.totalorder %v3754_v41, 0  ;;  %vm828_vm8 = vcmp.eq.s32.totalorder %v3754_v41, 2  ;;  %v354_v61 = vpop.permute.xlu0 %353 }
  0x94   :  { %v2988_v39 = vpop.eup %2987  ;;  %v206_v46 = vmul.f32 %v2986_v59, %v3700_v63  ;;  %v714_v50 = vsel %vm629_vm2, %v713_v51, %v3696_v27  ;;  %v1042_v17 = vand.u32 2139095040, %v3774_v3  ;;  %vm1868_vm9 = vcmp.lt.s32.totalorder %v1867_v23, 2  ;;  %v3796_v27 = vld [vmem:[%s4657_s3 + $0x38] sm:$0xff] }
  0x95   :  { %v695_v47 = vclz %v2745_v42  ;;  %v2990_v28 = vpop.eup %2989  ;;  %vm1869_vm10 = vcmp.eq.s32.totalorder %v1867_v23, 0  ;;  %vm1872_vm11 = vcmp.eq.s32.totalorder %v1867_v23, 2  ;;  %2991 = vrsqrt.f32 %v3778_v33 }
  0x96   :  { %v826_v44 = vxor.u32 2147483648, %v2990_v28  ;;  %v208_v1 = vsel %vm207_vm0, %v3700_v63, %v206_v46  ;;  %v3791_v29 = vadd.f32 %v177_v18, %v167_v57  ;;  %v1043_v49 = vshrl.u32 %v1042_v17, 23 }
  0x97   :  { %v2746_v16 = vadd.s32 4294967294, %v695_v47  ;;  %v716_v8 = vsel %vm3758_vm3, 0, %v714_v50  ;;  %v1039_v52 = vand.u32 2147483647, %v3774_v3  ;;  %v394_v47 = vmul.f32 %v359_v30, %v218_v35 }
  0x98   :  { %v827_v0 = vsel %vm825_vm7, %v2988_v39, %v826_v44  ;;  %v2760_v15 = vadd.s32 4294967169, %v1043_v49  ;;  %v1871_v19 = vsel %vm1869_vm10, %v2988_v39, %v826_v44  ;;  %v1145_v36 = vand.u32 2139095040, %v3796_v27 }
  0x99   :  { %vm2747_vm4 = vcmp.lt.s32.totalorder %v2746_v16, 0  ;;  %v334_v24 = vmul.f32 %v3662_v11, %v3740_v48  ;;  %v1762_v54 = vadd.s32 3, %v716_v8  ;;  %v333_v57 = vmul.f32 %v3680_v34, %v3742_v56 }
  0x9a   :  { %v698_v31 = vsel %vm2747_vm4, 0, %v2746_v16  ;;  %v1049_v45 = vadd.s32 1, %v2760_v15  ;;  %v1146_v51 = vshrl.u32 %v1145_v36, 23  ;;  %v3821_v63 = vand.u32 3, %v716_v8 }
  0x9b   :  { %v699_v55 = vsub.s32 32, %v698_v31  ;;  %v700_v22 = vshll.u32 %v3707_v37, %v698_v31  ;;  %v703_v62 = vsub.s32 4294967266, %v698_v31  ;;  %v829_v37 = vxor.u32 2147483648, %v2988_v39 }
  0x9c   :  { %v1046_v31 = vand.u32 8388607, %v1039_v52  ;;  %v3819_v11 = vadd.f32 %v394_v47, %v334_v24  ;;  %vm1050_vm12 = vcmp.gt.s32.totalorder %v1049_v45, 0  ;;  %vm725_vm13 = vcmp.eq.s32.totalorder %v3821_v63, 2 }
  0x9d   :  { %v701_v12 = vshrl.u32 %v683_v40, %v699_v55  ;;  %v704_v60 = vadd.s32 127, %v703_v62  ;;  %v830_v6 = vsel %vm828_vm8, %v829_v37, %v2990_v28  ;;  %v1874_v16 = vsel %vm1872_vm11, %v829_v37, %v2990_v28 }
  0x9e   :  { %v211_v40 = vsel %vm209_vm15, %v210_v10, %v208_v1  ;;  %v831_v35 = vsel %vm824_vm5, %v827_v0, %v830_v6  ;;  %v1875_v18 = vsel %vm1868_vm9, %v1871_v19, %v1874_v16  ;;  %v1051_v55 = vsel %vm1050_vm12, %v1049_v45, 0 }
  0x9f   :  { %v702_v43 = vor.u32 %v701_v12, %v700_v22  ;;  %v705_v14 = vshll.u32 %v704_v60, 23  ;;  %v393_v39 = vmul.f32 %v354_v61, %v211_v40  ;;  %v3825_v41 = vsel %vm822_vm6, nan, %v831_v35  ;;  %v3834_v12 = vpop.eup %2991 }
  0xa0   :  { %v3827_v22 = vand.u32 3, %v1762_v54  ;;  %v1053_v28 = vand.u32 31, %v1051_v55  ;;  %v1142_v62 = vand.u32 2147483647, %v3796_v27  ;;  %v1876_v34 = vsel %vm822_vm6, nan, %v1875_v18 }
  0xa1   :  { %v706_v42 = vor.u32 4788187, %v705_v14  ;;  %v709_v58 = vcvt.s32.f32 %v702_v43  ;;  %v1047_v23 = vor.u32 8388608, %v1046_v31  ;;  %v2764_v10 = vadd.s32 4294967169, %v1146_v51 }
  0xa2   :  { %v1052_v60 = vshrl.u32 %v1051_v55, 5  ;;  %v1054_v50 = vsub.s32 32, %v1053_v28  ;;  %v1056_v44 = vshll.u32 %v3041_v2, %v1053_v28  ;;  %v1059_v37 = vshll.u32 %v3042_v5, %v1053_v28 }
  0xa3   :  { %v707_v20 = vand.u32 2147483647, %v706_v42  ;;  %v1062_v38 = vshll.u32 %v3043_v7, %v1053_v28  ;;  %v1065_v43 = vshll.u32 %v3044_v9, %v1053_v28  ;;  %v1149_v4 = vand.u32 8388607, %v1142_v62 }
  0xa4   :  { %v1055_v17 = vshrl.u32 %v3041_v2, %v1054_v50  ;;  %v1057_v30 = vshrl.u32 %v3042_v5, %v1054_v50  ;;  %vm1768_vm14 = vcmp.eq.s32.totalorder %v3827_v22, 2  ;;  %v1060_v14 = vshrl.u32 %v3043_v7, %v1054_v50 }
  0xa5   :  { %v710_v59 = vmul.f32 %v709_v58, %v707_v20  ;;  %v1063_v1 = vshrl.u32 %v3044_v9, %v1054_v50  ;;  %v1066_v49 = vshrl.u32 %v3045_v13, %v1054_v50  ;;  %v1068_v42 = vshll.u32 %v3045_v13, %v1053_v28 }
  0xa6   :  { %vm722_vm1 = vcmp.eq.s32.totalorder %v3821_v63, 0  ;;  %v1058_v58 = vor.u32 %v1057_v30, %v1056_v44  ;;  %v1069_v8 = vshrl.u32 %v3046_v21, %v1054_v50  ;;  %v3856_v0 = vshll.u32 %v1047_v23, 8 }
  0xa7   :  { %v711_v48 = vxor.u32 2147483648, %v710_v59  ;;  %vm721_vm4 = vcmp.lt.s32.totalorder %v3821_v63, 2  ;;  %vm1764_vm0 = vcmp.lt.s32.totalorder %v3827_v22, 2  ;;  %v1061_v6 = vor.u32 %v1060_v14, %v1059_v37 }
  0xa8   :  { %v1064_v47 = vor.u32 %v1063_v1, %v1062_v38  ;;  %v1067_v15 = vor.u32 %v1066_v49, %v1065_v43  ;;  %v1152_v19 = vadd.s32 1, %v2764_v10  ;;  %vm719_vm15 = vweird.f32 %v3426_v53 }
  0xa9   :  { %v712_v56 = vsel %vm629_vm2, %v711_v48, %v710_v59  ;;  %vm1765_vm2 = vcmp.eq.s32.totalorder %v3827_v22, 0  ;;  %v1070_v16 = vor.u32 %v1069_v8, %v1068_v42  ;;  %vm1072_vm5 = vcmp.lt.s32.totalorder %v1052_v60, 2 }
  0xaa   :  { %v715_v46 = vsel %vm3758_vm3, %v3426_v53, %v712_v56  ;;  %vm1071_vm3 = vcmp.lt.s32.totalorder %v1052_v60, 1  ;;  %vm1073_vm6 = vcmp.lt.s32.totalorder %v1052_v60, 3  ;;  %v1150_v20 = vor.u32 8388608, %v1149_v4  ;;  %v3870_v56 = vld [vmem:[%s4657_s3 + $0x28] sm:$0xff] }
  0xab   :  { %2993 = vcosq.f32 %v715_v46  ;;  %vm1074_vm7 = vcmp.lt.s32.totalorder %v1052_v60, 4  ;;  %v1075_v36 = vsel %vm1071_vm3, %v1055_v17, %v1058_v58  ;;  %v1079_v24 = vsel %vm1071_vm3, %v1058_v58, %v1061_v6 }
  0xac   :  { %2995 = vsinq.f32 %v715_v46  ;;  %v1083_v54 = vsel %vm1071_vm3, %v1061_v6, %v1064_v47  ;;  %v403_v61 = vadd.f32 %v393_v39, %v333_v57  ;;  %v1076_v40 = vsel %vm1074_vm7, %v1064_v47, 2102212464 }
  0xad   :  { %v1080_v45 = vsel %vm1074_vm7, %v1067_v15, 920167782  ;;  %v1084_v35 = vsel %vm1074_vm7, %v1070_v16, 1326507024  ;;  %v1077_v59 = vsel %vm1073_vm6, %v1061_v6, %v1076_v40  ;;  %vm1153_vm8 = vcmp.gt.s32.totalorder %v1152_v19, 0 }
  0xae   :  { %v1081_v31 = vsel %vm1073_vm6, %v1064_v47, %v1080_v45  ;;  %v1085_v51 = vsel %vm1073_vm6, %v1067_v15, %v1084_v35  ;;  %v1078_v18 = vsel %vm1072_vm5, %v1075_v36, %v1077_v59  ;;  %v1154_v28 = vsel %vm1153_vm8, %v1152_v19, 0 }
  0xaf   :  { %v1082_v48 = vsel %vm1072_vm5, %v1079_v24, %v1081_v31  ;;  %v1086_v55 = vsel %vm1072_vm5, %v1083_v54, %v1085_v51  ;;  %v1454_v60 = vmul.f32 %v3825_v41, %v3819_v11  ;;  %v2504_v44 = vmul.f32 %v1876_v34, %v3819_v11 }
  0xb0   :  { %v3873_v39 = vmul.u32.u64.low %v3856_v0, %v1086_v55  ;;  %v3874_v23 = vmul.u32.u64.high %v3856_v0, %v1086_v55, %v3873_v39  ;;  %v3877_v10 = vmul.u32.u64.low %v3856_v0, %v1082_v48  ;;  %v3878_v46 = vmul.u32.u64.high %v3856_v0, %v1082_v48, %v3877_v10 }
  0xb1   :  { %v1156_v38 = vand.u32 31, %v1154_v28  ;;  %v1094_v17 = vmul.u32 %v3856_v0, %v1078_v18  ;;  %v3885_v30 = vshll.u32 %v1150_v20, 8  ;;  %v939_v4 = vand.u32 2139095040, %v3870_v56 }
  0xb2   :  { %v1155_v49 = vshrl.u32 %v1154_v28, 5  ;;  %vm1096_vm9 = vc.u32 %v3874_v23, %v3877_v10  ;;  %v1097_v0 = vadd.s32 1, %v3878_v46  ;;  %2997 = vrsqrt.f32 %v3791_v29 }
  0xb3   :  { %v1157_v42 = vsub.s32 32, %v1156_v38  ;;  %v1159_v34 = vshll.u32 %v3041_v2, %v1156_v38  ;;  %v1162_v16 = vshll.u32 %v3042_v5, %v1156_v38  ;;  %v1165_v40 = vshll.u32 %v3043_v7, %v1156_v38 }
  0xb4   :  { %v1098_v36 = vsel %vm1096_vm9, %v1097_v0, %v3878_v46  ;;  %v1168_v31 = vshll.u32 %v3044_v9, %v1156_v38  ;;  %vm1174_vm10 = vcmp.lt.s32.totalorder %v1155_v49, 1  ;;  %vm1175_vm11 = vcmp.lt.s32.totalorder %v1155_v49, 2 }
  0xb5   :  { %v2994_v57 = vpop.eup %2993  ;;  %v1158_v6 = vshrl.u32 %v3041_v2, %v1157_v42  ;;  %v1160_v19 = vshrl.u32 %v3042_v5, %v1157_v42  ;;  %v1163_v22 = vshrl.u32 %v3043_v7, %v1157_v42  ;;  %v1099_v24 = vadd.s32 %v1098_v36, %v1094_v17 }
  0xb6   :  { %v2996_v50 = vpop.eup %2995  ;;  %v726_v37 = vxor.u32 2147483648, %v2994_v57  ;;  %v1166_v45 = vshrl.u32 %v3044_v9, %v1157_v42  ;;  %v1169_v48 = vshrl.u32 %v3045_v13, %v1157_v42  ;;  %v1172_v55 = vshrl.u32 %v3046_v21, %v1157_v42 }
  0xb7   :  { %v723_v43 = vxor.u32 2147483648, %v2996_v50  ;;  %v1161_v54 = vor.u32 %v1160_v19, %v1159_v34  ;;  %v1164_v53 = vor.u32 %v1163_v22, %v1162_v16  ;;  %v1100_v51 = vadd.s32 536870912, %v1099_v24 }
  0xb8   :  { %v727_v14 = vsel %vm725_vm13, %v726_v37, %v2996_v50  ;;  %v1770_v1 = vsel %vm1768_vm14, %v726_v37, %v2996_v50  ;;  %v1167_v18 = vor.u32 %v1166_v45, %v1165_v40  ;;  %v940_v28 = vshrl.u32 %v939_v4, 23 }
  0xb9   :  { %v724_v11 = vsel %vm722_vm1, %v2994_v57, %v723_v43  ;;  %v1767_v41 = vsel %vm1765_vm2, %v2994_v57, %v723_v43  ;;  %v32_v57 = vld [vmem:[%s4659_s0 + $0x58] sm:$0xff]  ;;  %v1101_v39 = vshrl.u32 %v1100_v51, 30  ;;  %v1170_v46 = vor.u32 %v1169_v48, %v1168_v31 }
  0xba   :  { %v728_v58 = vsel %vm721_vm4, %v724_v11, %v727_v14  ;;  %v1771_v8 = vsel %vm1764_vm0, %v1767_v41, %v1770_v1  ;;  %vm1176_vm12 = vcmp.lt.s32.totalorder %v1155_v49, 3  ;;  %vm1177_vm13 = vcmp.lt.s32.totalorder %v1155_v49, 4  ;;  %v29_v41 = vld [vmem:[%s4659_s0 + $0x40] sm:$0xff] }
  0xbb   :  { %v729_v47 = vsel %vm719_vm15, nan, %v728_v58  ;;  %v1772_v15 = vsel %vm719_vm15, nan, %v1771_v8  ;;  %v1182_v37 = vsel %vm1174_vm10, %v1161_v54, %v1164_v53  ;;  %v1183_v17 = vsel %vm1177_vm13, %v1170_v46, 920167782 }
  0xbc   :  { %v1453_v20 = vmul.f32 %v729_v47, %v403_v61  ;;  %v2503_v63 = vmul.f32 %v1772_v15, %v403_v61  ;;  %v1171_v61 = vshll.u32 %v3045_v13, %v1156_v38  ;;  %v1102_v38 = vshll.u32 %v1101_v39, 30 }
  0xbd   :  { %v1186_v4 = vsel %vm1174_vm10, %v1164_v53, %v1167_v18  ;;  %v76_v14 = vmul.f32 %v32_v57, %v32_v57  ;;  %v1184_v1 = vsel %vm1176_vm12, %v1167_v18, %v1183_v17  ;;  %v2756_v11 = vadd.s32 4294967169, %v940_v28  ;;  %v2998_v57 = vpop.eup %2997 }
  0xbe   :  { %v2514_v35 = vpack.c.bf16 %v2504_v44, %v2503_v63  ;;  %v2513_v59 = vpack.c.bf16 %v1454_v60, %v1453_v20  ;;  %v1173_v50 = vor.u32 %v1172_v55, %v1171_v61  ;;  %v1178_v60 = vsel %vm1174_vm10, %v1158_v6, %v1161_v54 }
  0xbf   :  { %v1179_v44 = vsel %vm1177_vm13, %v1167_v18, 2102212464  ;;  %v3931_v34 = vsub.s32 %v1099_v24, %v1102_v38  ;;  %v1185_v58 = vsel %vm1175_vm11, %v1182_v37, %v1184_v1  ;;  %vm242_vm14 = vcmp.eq.f32.partialorder %v3778_v33, inf }
  0xc0   :  { %2689 = vmatprep.mubr.bf16.mxu0 %v2514_v35  ;;  %v1180_v43 = vsel %vm1176_vm12, %v1164_v53, %v1179_v44  ;;  %v1187_v42 = vsel %vm1177_vm13, %v1173_v50, 1326507024  ;;  %v3938_v47 = vmul.u32.u64.low %v3885_v30, %v1185_v58  ;;  %v3939_v15 = vmul.u32.u64.high %v3885_v30, %v1185_v58, %v3938_v47  ;;  %v30_v35 = vld [vmem:[%s4659_s0 + $0x48] sm:$0xff] }
  0xc1   :  { %2690 = vmatmul.mubr.bf16.gmra.mrb[4].mxu0 %v2513_v59  ;;  %v1188_v8 = vsel %vm1176_vm12, %v1170_v46, %v1187_v42  ;;  %v1181_v0 = vsel %vm1175_vm11, %v1178_v60, %v1180_v43  ;;  %v1105_v19 = vsub.s32 0, %v3931_v34  ;;  %v3948_v63 = vmul.f32 %v29_v41, %v29_v41 }
  0xc2   :  { %v1189_v6 = vsel %vm1175_vm11, %v1186_v4, %v1188_v8  ;;  %v946_v36 = vadd.s32 1, %v2756_v11  ;;  %v241_v49 = vmul.f32 %v3834_v12, %v3778_v33  ;;  %vm244_vm1 = vcmp.eq.f32.partialorder %v3778_v33, 0.0 }
  0xc3   :  { %v3944_v16 = vmul.u32.u64.low %v3885_v30, %v1189_v6  ;;  %v3945_v20 = vmul.u32.u64.high %v3885_v30, %v1189_v6, %v3944_v16  ;;  %v2761_v22 = vmin.u32 %v1105_v19, %v3931_v34  ;;  %v1197_v24 = vmul.u32 %v3885_v30, %v1181_v0 }
  0xc4   :  { %v3956_v54 = vadd.f32 %v76_v14, %v3767_v32  ;;  %v1200_v40 = vadd.s32 1, %v3939_v15  ;;  %v936_v45 = vand.u32 2147483647, %v3870_v56  ;;  %vm947_vm2 = vcmp.gt.s32.totalorder %v946_v36, 0 }
  0xc5   :  { %v1107_v59 = vclz %v2761_v22  ;;  %v1125_v12 = vsub.s32 4, %v1101_v39  ;;  %vm1199_vm3 = vc.u32 %v3945_v20, %v3938_v47  ;;  %v948_v53 = vsel %vm947_vm2, %v946_v36, 0 }
  0xc6   :  { %v245_v30 = vand.u32 2147483648, %v3778_v33  ;;  %vm235_vm4 = vcmp.eq.f32.partialorder %v3791_v29, inf  ;;  %v238_v32 = vand.u32 2147483648, %v3791_v29  ;;  %v1201_v31 = vsel %vm1199_vm3, %v1200_v40, %v3939_v15 }
  0xc7   :  { %v243_v51 = vsel %vm242_vm14, %v3778_v33, %v241_v49  ;;  %v2762_v18 = vadd.s32 4294967294, %v1107_v59  ;;  %v1202_v48 = vadd.s32 %v1201_v31, %v1197_v24  ;;  %v950_v61 = vand.u32 31, %v948_v53 }
  0xc8   :  { %2999 = vrsqrt.f32 %v3956_v54  ;;  %v3973_v55 = vmul.f32 %v30_v35, %v30_v35  ;;  %vm1041_vm0 = vcmp.lt.s32.totalorder %v3774_v3, 0  ;;  %v943_v28 = vand.u32 8388607, %v936_v45 }
  0xc9   :  { %v1095_v46 = vadd.s32 %v3877_v10, %v3874_v23  ;;  %vm2763_vm15 = vcmp.lt.s32.totalorder %v2762_v18, 0  ;;  %v1126_v50 = vsel %vm1041_vm0, %v1125_v12, %v1101_v39  ;;  %v1203_v60 = vadd.s32 536870912, %v1202_v48 }
  0xca   :  { %v3984_v44 = vsel %vm244_vm1, %v245_v30, %v243_v51  ;;  %vm3988_vm5 = vcmp.le.f32.partialorder %v1039_v52, 0.7853982  ;;  %v1110_v38 = vsel %vm2763_vm15, 0, %v2762_v18  ;;  %v951_v43 = vsub.s32 32, %v950_v61 }
  0xcb   :  { %v1111_v17 = vsub.s32 32, %v1110_v38  ;;  %v1112_v23 = vshll.u32 %v3931_v34, %v1110_v38  ;;  %v1115_v10 = vsub.s32 4294967266, %v1110_v38  ;;  %v3993_v4 = vshrl.u32 %v1203_v60, 30 }
  0xcc   :  { %v234_v39 = vmul.f32 %v2998_v57, %v3791_v29  ;;  %v3998_v33 = vsel %vm3988_vm5, 0, %v1126_v50  ;;  %v944_v14 = vor.u32 8388608, %v943_v28  ;;  %v4000_v1 = vshrl.u32 %v948_v53, 5 }
  0xcd   :  { %v1113_v52 = vshrl.u32 %v1095_v46, %v1111_v17  ;;  %v1116_v42 = vadd.s32 127, %v1115_v10  ;;  %v1205_v11 = vshll.u32 %v3993_v4, 30  ;;  %v953_v41 = vshll.u32 %v3041_v2, %v950_v61  ;;  %v4032_v46 = vld [vmem:[%s4657_s3 + $0x20] sm:$0xff] }
  0xce   :  { %v954_v34 = vshrl.u32 %v3042_v5, %v951_v43  ;;  %v956_v58 = vshll.u32 %v3042_v5, %v950_v61  ;;  %v957_v8 = vshrl.u32 %v3043_v7, %v951_v43  ;;  %v959_v0 = vshll.u32 %v3043_v7, %v950_v61 }
  0xcf   :  { %v1114_v6 = vor.u32 %v1113_v52, %v1112_v23  ;;  %v1117_v15 = vshll.u32 %v1116_v42, 23  ;;  %v4008_v19 = vsub.s32 %v1202_v48, %v1205_v11  ;;  %v960_v16 = vshrl.u32 %v3044_v9, %v951_v43 }
  0xd0   :  { %v962_v36 = vshll.u32 %v3044_v9, %v950_v61  ;;  %v963_v49 = vshrl.u32 %v3045_v13, %v951_v43  ;;  %v965_v22 = vshll.u32 %v3045_v13, %v950_v61  ;;  %v966_v24 = vshrl.u32 %v3046_v21, %v951_v43 }
  0xd1   :  { %v236_v40 = vsel %vm235_vm4, %v3791_v29, %v234_v39  ;;  %v1118_v35 = vor.u32 4788187, %v1117_v15  ;;  %v1121_v59 = vcvt.s32.f32 %v1114_v6  ;;  %v1208_v12 = vsub.s32 0, %v4008_v19 }
  0xd2   :  { %v4019_v53 = vpop.eup %2999  ;;  %v4022_v30 = vadd.s32 3, %v3998_v33  ;;  %v952_v31 = vshrl.u32 %v3041_v2, %v951_v43  ;;  %v955_v51 = vor.u32 %v954_v34, %v953_v41  ;;  %v4025_v18 = vshll.u32 %v944_v14, 8 }
  0xd3   :  { %vm237_vm6 = vcmp.eq.f32.partialorder %v3791_v29, 0.0  ;;  %v1119_v48 = vand.u32 2147483647, %v1118_v35  ;;  %v2765_v61 = vmin.u32 %v1208_v12, %v4008_v19  ;;  %v958_v28 = vor.u32 %v957_v8, %v956_v58 }
  0xd4   :  { %v961_v57 = vor.u32 %v960_v16, %v959_v0  ;;  %v964_v50 = vor.u32 %v963_v49, %v962_v36  ;;  %v967_v60 = vor.u32 %v966_v24, %v965_v22  ;;  %vm968_vm7 = vcmp.lt.s32.totalorder %v4000_v1, 1  ;;  %v379_v49 = vpop.permute.xlu1 %378 }
  0xd5   :  { %vm971_vm8 = vcmp.lt.s32.totalorder %v4000_v1, 4  ;;  %v1122_v38 = vmul.f32 %v1121_v59, %v1119_v48  ;;  %v1198_v43 = vadd.s32 %v3938_v47, %v3945_v20  ;;  %v1210_v17 = vclz %v2765_v61 }
  0xd6   :  { %v973_v23 = vsel %vm971_vm8, %v961_v57, 2102212464  ;;  %v1228_v10 = vsub.s32 4, %v3993_v4  ;;  %vm969_vm9 = vcmp.lt.s32.totalorder %v4000_v1, 2  ;;  %vm970_vm10 = vcmp.lt.s32.totalorder %v4000_v1, 3 }
  0xd7   :  { %v836_v39 = vand.u32 2139095040, %v4032_v46  ;;  %v1123_v14 = vxor.u32 2147483648, %v1122_v38  ;;  %v2766_v52 = vadd.s32 4294967294, %v1210_v17  ;;  %v972_v42 = vsel %vm968_vm7, %v952_v31, %v955_v51 }
  0xd8   :  { %v976_v47 = vsel %vm968_vm7, %v955_v51, %v958_v28  ;;  %v974_v20 = vsel %vm970_vm10, %v958_v28, %v973_v23  ;;  %v977_v11 = vsel %vm971_vm8, %v964_v50, 920167782  ;;  %v980_v41 = vsel %vm968_vm7, %v958_v28, %v961_v57 }
  0xd9   :  { %v981_v34 = vsel %vm971_vm8, %v967_v60, 1326507024  ;;  %v1124_v58 = vsel %vm1041_vm0, %v1123_v14, %v1122_v38  ;;  %vm2767_vm11 = vcmp.lt.s32.totalorder %v2766_v52, 0  ;;  %v978_v8 = vsel %vm970_vm10, %v961_v57, %v977_v11  ;;  %v374_v57 = vpop.permute.xlu0 %373 }
  0xda   :  { %v982_v0 = vsel %vm970_vm10, %v964_v50, %v981_v34  ;;  %v1127_v6 = vsel %vm3988_vm5, %v3774_v3, %v1124_v58  ;;  %v1213_v15 = vsel %vm2767_vm11, 0, %v2766_v52  ;;  %v979_v16 = vsel %vm969_vm9, %v976_v47, %v978_v8 }
  0xdb   :  { %v983_v36 = vsel %vm969_vm9, %v980_v41, %v982_v0  ;;  %3001 = vcosq.f32 %v1127_v6  ;;  %v1214_v22 = vsub.s32 32, %v1213_v15  ;;  %v1215_v24 = vshll.u32 %v4008_v19, %v1213_v15 }
  0xdc   :  { %v1218_v35 = vsub.s32 4294967266, %v1213_v15  ;;  %3003 = vsinq.f32 %v1127_v6  ;;  %v975_v59 = vsel %vm969_vm9, %v972_v42, %v974_v20  ;;  %v398_v28 = vmul.f32 %v379_v49, %v3984_v44  ;;  %v51_v44 = vld [vmem:[%s4658_s1 + $0x50] sm:$0xff] }
  0xdd   :  { %v4067_v37 = vmul.u32.u64.low %v4025_v18, %v983_v36  ;;  %v4068_v12 = vmul.u32.u64.high %v4025_v18, %v983_v36, %v4067_v37  ;;  %v1216_v31 = vshrl.u32 %v1198_v43, %v1214_v22  ;;  %v239_v19 = vsel %vm237_vm6, %v238_v32, %v236_v40 }
  0xde   :  { %v1219_v51 = vadd.s32 127, %v1218_v35  ;;  %v4071_v48 = vmul.u32.u64.low %v4025_v18, %v979_v16  ;;  %v4072_v61 = vmul.u32.u64.high %v4025_v18, %v979_v16, %v4071_v48  ;;  %v4082_v1 = vadd.f32 %v3973_v55, %v3948_v63 }
  0xdf   :  { %vm1144_vm12 = vcmp.lt.s32.totalorder %v3796_v27, 0  ;;  %v4086_v50 = vand.u32 3, %v3998_v33  ;;  %v1217_v60 = vor.u32 %v1216_v31, %v1215_v24  ;;  %v837_v43 = vshrl.u32 %v836_v39, 23 }
  0xe0   :  { %v1220_v38 = vshll.u32 %v1219_v51, 23  ;;  %v1229_v29 = vsel %vm1144_vm12, %v1228_v10, %v3993_v4  ;;  %v2179_v63 = vand.u32 3, %v4022_v30  ;;  %v991_v32 = vmul.u32 %v4025_v18, %v975_v59 }
  0xe1   :  { %vm993_vm13 = vc.u32 %v4068_v12, %v4071_v48  ;;  %v1224_v33 = vcvt.s32.f32 %v1217_v60  ;;  %v994_v40 = vadd.s32 1, %v4072_v61  ;;  %v2752_v17 = vadd.s32 4294967169, %v837_v43 }
  0xe2   :  { %v1221_v55 = vor.u32 4788187, %v1220_v38  ;;  %v397_v23 = vmul.f32 %v374_v57, %v239_v19  ;;  %3005 = vrsqrt.f32 %v4082_v1  ;;  %vm4102_vm14 = vcmp.le.f32.partialorder %v1142_v62, 0.7853982  ;;  %v52_v62 = vld [vmem:[%s4658_s1 + $0x58] sm:$0xff]  ;;  %v49_v38 = vld [vmem:[%s4658_s1 + $0x40] sm:$0xff] }
  0xe3   :  { %v166_v4 = vmul.f32 %v51_v44, %v51_v44  ;;  %vm1133_vm1 = vcmp.lt.s32.totalorder %v4086_v50, 2  ;;  %v995_v18 = vsel %vm993_vm13, %v994_v40, %v4072_v61  ;;  %v843_v10 = vadd.s32 1, %v2752_v17  ;;  %v50_v44 = vld [vmem:[%s4658_s1 + $0x48] sm:$0xff] }
  0xe4   :  { %v1222_v30 = vand.u32 2147483647, %v1221_v55  ;;  %vm1134_vm2 = vcmp.eq.s32.totalorder %v4086_v50, 0  ;;  %v1231_v14 = vsel %vm4102_vm14, 0, %v1229_v29  ;;  %v996_v52 = vadd.s32 %v995_v18, %v991_v32 }
  0xe5   :  { %v833_v42 = vand.u32 2147483647, %v4032_v46  ;;  %v3002_v47 = vpop.eup %3001  ;;  %vm1137_vm3 = vcmp.eq.s32.totalorder %v4086_v50, 2  ;;  %vm2181_vm4 = vcmp.eq.s32.totalorder %v2179_v63, 0  ;;  %vm844_vm0 = vcmp.gt.s32.totalorder %v843_v10, 0 }
  0xe6   :  { %v1225_v20 = vmul.f32 %v1224_v33, %v1222_v30  ;;  %v3004_v11 = vpop.eup %3003  ;;  %v1138_v41 = vxor.u32 2147483648, %v3002_v47  ;;  %vm2184_vm15 = vcmp.eq.s32.totalorder %v2179_v63, 2  ;;  %v997_v34 = vadd.s32 536870912, %v996_v52  ;;  %v4176_v30 = vld [vmem:[%s4657_s3 + $0x48] sm:$0xf] }
  0xe7   :  { %v845_v58 = vsel %vm844_vm0, %v843_v10, 0  ;;  %v1135_v8 = vxor.u32 2147483648, %v3004_v11  ;;  %v2282_v6 = vadd.s32 3, %v1231_v14  ;;  %v176_v15 = vmul.f32 %v52_v62, %v52_v62 }
  0xe8   :  { %v1226_v0 = vxor.u32 2147483648, %v1225_v20  ;;  %v4116_v16 = vand.u32 3, %v1231_v14  ;;  %vm2180_vm5 = vcmp.lt.s32.totalorder %v2179_v63, 2  ;;  %v4118_v36 = vshrl.u32 %v997_v34, 30 }
  0xe9   :  { %v840_v49 = vand.u32 8388607, %v833_v42  ;;  %v1139_v22 = vsel %vm1137_vm3, %v1138_v41, %v3004_v11  ;;  %v2186_v35 = vsel %vm2184_vm15, %v1138_v41, %v3004_v11  ;;  %v847_v59 = vand.u32 31, %v845_v58 }
  0xea   :  { %v1227_v24 = vsel %vm1144_vm12, %v1226_v0, %v1225_v20  ;;  %v1136_v37 = vsel %vm1134_vm2, %v3002_v47, %v1135_v8  ;;  %v2183_v51 = vsel %vm2181_vm4, %v3002_v47, %v1135_v8  ;;  %v999_v61 = vshll.u32 %v4118_v36, 30 }
  0xeb   :  { %v1230_v31 = vsel %vm4102_vm14, %v3796_v27, %v1227_v24  ;;  %v4134_v19 = vadd.f32 %v398_v28, %v3686_v26  ;;  %v4136_v57 = vand.u32 3, %v2282_v6  ;;  %v4138_v60 = vadd.f32 %v176_v15, %v166_v4 }
  0xec   :  { %3007 = vcosq.f32 %v1230_v31  ;;  %v4146_v43 = vpop.eup %3005  ;;  %v407_v29 = vadd.f32 %v397_v23, %v3698_v25  ;;  %v4149_v26 = vsub.s32 %v996_v52, %v999_v61  ;;  %v841_v28 = vor.u32 8388608, %v840_v49 }
  0xed   :  { %3009 = vsinq.f32 %v1230_v31  ;;  %vm1131_vm6 = vweird.f32 %v3774_v3  ;;  %v1140_v32 = vsel %vm1133_vm1, %v1136_v37, %v1139_v22  ;;  %v2187_v55 = vsel %vm2180_vm5, %v2183_v51, %v2186_v35 }
  0xee   :  { %v848_v33 = vsub.s32 32, %v847_v59  ;;  %vm1237_vm7 = vcmp.eq.s32.totalorder %v4116_v16, 0  ;;  %vm1240_vm8 = vcmp.eq.s32.totalorder %v4116_v16, 2  ;;  %v1002_v40 = vsub.s32 0, %v4149_v26 }
  0xef   :  { %v165_v17 = vmul.f32 %v49_v38, %v49_v38  ;;  %v175_v25 = vmul.f32 %v50_v44, %v50_v44  ;;  %vm1236_vm9 = vcmp.lt.s32.totalorder %v4116_v16, 2  ;;  %vm2284_vm10 = vcmp.lt.s32.totalorder %v4136_v57, 2 }
  0xf0   :  { %vm2285_vm11 = vcmp.eq.s32.totalorder %v4136_v57, 0  ;;  %vm2288_vm12 = vcmp.eq.s32.totalorder %v4136_v57, 2  ;;  %v992_v50 = vadd.s32 %v4071_v48, %v4068_v12  ;;  %3011 = vrsqrt.f32 %v4138_v60 }
  0xf1   :  { %v1141_v63 = vsel %vm1131_vm6, nan, %v1140_v32  ;;  %vm1234_vm13 = vweird.f32 %v3796_v27  ;;  %v2188_v23 = vsel %vm1131_vm6, nan, %v2187_v55  ;;  %v2757_v39 = vmin.u32 %v1002_v40, %v4149_v26 }
  0xf2   :  { %v4171_v4 = vshll.u32 %v841_v28, 8  ;;  %v850_v12 = vshll.u32 %v3041_v2, %v847_v59  ;;  %v851_v48 = vshrl.u32 %v3042_v5, %v848_v33  ;;  %v853_v18 = vshll.u32 %v3042_v5, %v847_v59 }
  0xf3   :  { %v854_v10 = vshrl.u32 %v3043_v7, %v848_v33  ;;  %v1004_v14 = vclz %v2757_v39  ;;  %v4182_v3 = vshrl.u32 %v845_v58, 5  ;;  %v856_v52 = vshll.u32 %v3043_v7, %v847_v59 }
  0xf4   :  { %v4185_v62 = vadd.f32 %v175_v25, %v165_v17  ;;  %v2507_v47 = vmul.f32 %v2188_v23, %v407_v29  ;;  %v1457_v20 = vmul.f32 %v1141_v63, %v407_v29  ;;  %v857_v11 = vshrl.u32 %v3044_v9, %v848_v33 }
  0xf5   :  { %v1351_v41 = vand.u32 2139095040, %v4176_v30  ;;  %v2758_v34 = vadd.s32 4294967294, %v1004_v14  ;;  %v849_v8 = vshrl.u32 %v3041_v2, %v848_v33  ;;  %v859_v0 = vshll.u32 %v3044_v9, %v847_v59 }
  0xf6   :  { %v860_v6 = vshrl.u32 %v3045_v13, %v848_v33  ;;  %v3008_v15 = vpop.eup %3007  ;;  %v852_v58 = vor.u32 %v851_v48, %v850_v12  ;;  %v855_v49 = vor.u32 %v854_v10, %v853_v18  ;;  %v858_v22 = vor.u32 %v857_v11, %v856_v52 }
  0xf7   :  { %v862_v24 = vshll.u32 %v3045_v13, %v847_v59  ;;  %v3010_v35 = vpop.eup %3009  ;;  %v1241_v37 = vxor.u32 2147483648, %v3008_v15  ;;  %vm2759_vm14 = vcmp.lt.s32.totalorder %v2758_v34, 0  ;;  %v863_v31 = vshrl.u32 %v3046_v21, %v848_v33 }
  0xf8   :  { %vm865_vm1 = vcmp.lt.s32.totalorder %v4182_v3, 1  ;;  %v1238_v51 = vxor.u32 2147483648, %v3010_v35  ;;  %v1007_v61 = vsel %vm2759_vm14, 0, %v2758_v34  ;;  %v861_v38 = vor.u32 %v860_v6, %v859_v0 }
  0xf9   :  { %vm866_vm2 = vcmp.lt.s32.totalorder %v4182_v3, 2  ;;  %v1242_v44 = vsel %vm1240_vm8, %v1241_v37, %v3010_v35  ;;  %v2290_v29 = vsel %vm2288_vm12, %v1241_v37, %v3010_v35  ;;  %v1008_v28 = vsub.s32 32, %v1007_v61 }
  0xfa   :  { %vm867_vm3 = vcmp.lt.s32.totalorder %v4182_v3, 3  ;;  %v3012_v59 = vpop.eup %3011  ;;  %v1239_v32 = vsel %vm1237_vm7, %v3008_v15, %v1238_v51  ;;  %v2287_v55 = vsel %vm2285_vm11, %v3008_v15, %v1238_v51  ;;  %v1012_v33 = vsub.s32 4294967266, %v1007_v61 }
  0xfb   :  { %vm868_vm4 = vcmp.lt.s32.totalorder %v4182_v3, 4  ;;  %v1243_v40 = vsel %vm1236_vm9, %v1239_v32, %v1242_v44  ;;  %v2291_v17 = vsel %vm2284_vm10, %v2287_v55, %v2290_v29  ;;  %v864_v25 = vor.u32 %v863_v31, %v862_v24  ;;  %v309_v32 = vpop.permute.xlu1 %308 }
  0xfc   :  { %v870_v63 = vsel %vm868_vm4, %v858_v22, 2102212464  ;;  %v1244_v23 = vsel %vm1234_vm13, nan, %v1243_v40  ;;  %v2292_v39 = vsel %vm1234_vm13, nan, %v2291_v17  ;;  %v1009_v12 = vshll.u32 %v4149_v26, %v1007_v61 }
  0xfd   :  { %v1013_v48 = vadd.s32 127, %v1012_v33  ;;  %v2508_v18 = vmul.f32 %v2292_v39, %v4134_v19  ;;  %v1010_v16 = vshrl.u32 %v992_v50, %v1008_v28  ;;  %v1458_v10 = vmul.f32 %v1244_v23, %v4134_v19 }
  0xfe   :  { %v869_v57 = vsel %vm865_vm1, %v849_v8, %v852_v58  ;;  %v871_v52 = vsel %vm867_vm3, %v855_v49, %v870_v63  ;;  %v873_v11 = vsel %vm865_vm1, %v852_v58, %v855_v49  ;;  %v874_v27 = vsel %vm868_vm4, %v861_v38, 920167782 }
  0xff   :  { %v1014_v14 = vshll.u32 %v1013_v48, 23  ;;  %v2518_v26 = vpack.c.bf16 %v2508_v18, %v2507_v47  ;;  %v2517_v34 = vpack.c.bf16 %v1458_v10, %v1457_v20  ;;  %v875_v50 = vsel %vm867_vm3, %v858_v22, %v874_v27 }
 0x100   :  { %v877_v19 = vsel %vm865_vm1, %v855_v49, %v858_v22  ;;  %vm128_vm0 = vcmp.eq.f32.partialorder %v3956_v54, inf  ;;  %v876_v8 = vsel %vm866_vm2, %v873_v11, %v875_v50  ;;  %v878_v0 = vsel %vm868_vm4, %v864_v25, 1326507024 }
 0x101   :  { %v127_v6 = vmul.f32 %v4019_v53, %v3956_v54  ;;  %2705 = vmatprep.mubr.bf16.mxu1 %v2518_v26  ;;  %v879_v47 = vsel %vm867_vm3, %v861_v38, %v878_v0  ;;  %v4241_v20 = vmul.u32.u64.low %v4171_v4, %v876_v8  ;;  %v4242_v15 = vmul.u32.u64.high %v4171_v4, %v876_v8, %v4241_v20 }
 0x102   :  { %v1011_v58 = vor.u32 %v1010_v16, %v1009_v12  ;;  %2706 = vmatmul.mubr.bf16.vlgmr.msra.gmra.mrb[0].mxu1 %v2517_v34  ;;  %v872_v49 = vsel %vm866_vm2, %v869_v57, %v871_v52  ;;  %v880_v22 = vsel %vm866_vm2, %v877_v19, %v879_v47  ;;  %3013 = vrsqrt.f32 %v4185_v62 }
 0x103   :  { %v1015_v53 = vor.u32 4788187, %v1014_v14  ;;  %v4251_v24 = vmul.u32.u64.low %v4171_v4, %v880_v22  ;;  %v4252_v35 = vmul.u32.u64.high %v4171_v4, %v880_v22, %v4251_v24  ;;  %v1352_v37 = vshrl.u32 %v1351_v41, 23 }
 0x104   :  { %v131_v31 = vand.u32 2147483648, %v3956_v54  ;;  %v888_v51 = vmul.u32 %v4171_v4, %v872_v49  ;;  %v891_v61 = vadd.s32 1, %v4242_v15  ;;  %v129_v3 = vsel %vm128_vm0, %v3956_v54, %v127_v6 }
 0x105   :  { %v2772_v38 = vadd.s32 4294967169, %v1352_v37  ;;  %vm130_vm15 = vcmp.eq.f32.partialorder %v3956_v54, 0.0  ;;  %v1016_v44 = vand.u32 2147483647, %v1015_v53  ;;  %v1018_v29 = vcvt.s32.f32 %v1011_v58 }
 0x106   :  { %vm890_vm5 = vc.u32 %v4252_v35, %v4241_v20  ;;  %v132_v55 = vsel %vm130_vm15, %v131_v31, %v129_v3  ;;  %v120_v4 = vmul.f32 %v4146_v43, %v4082_v1  ;;  %vm121_vm7 = vcmp.eq.f32.partialorder %v4082_v1, inf }
 0x107   :  { %v1358_v28 = vadd.s32 1, %v2772_v38  ;;  %v892_v41 = vsel %vm890_vm5, %v891_v61, %v4242_v15  ;;  %v1348_v40 = vand.u32 2147483647, %v4176_v30  ;;  %v1019_v17 = vmul.f32 %v1018_v29, %v1016_v44  ;;  %v4330_v29 = vpop.permute.xlu0 %303 }
 0x108   :  { %v893_v33 = vadd.s32 %v892_v41, %v888_v51  ;;  %v227_v25 = vmul.f32 %v3012_v59, %v4138_v60  ;;  %v4271_v12 = vmul.f32 %v309_v32, %v132_v55  ;;  %v124_v48 = vand.u32 2147483648, %v4082_v1 }
 0x109   :  { %vm1359_vm6 = vcmp.gt.s32.totalorder %v1358_v28, 0  ;;  %v1022_v18 = vsub.s32 4, %v4118_v36  ;;  %vm228_vm8 = vcmp.eq.f32.partialorder %v4138_v60, inf  ;;  %v4277_v43 = vsel %vm121_vm7, %v4082_v1, %v120_v4 }
 0x10a   :  { %v1360_v54 = vsel %vm1359_vm6, %v1358_v28, 0  ;;  %v894_v63 = vadd.s32 536870912, %v893_v33  ;;  %vm4281_vm9 = vcmp.le.f32.partialorder %v936_v45, 0.7853982  ;;  %vm938_vm10 = vcmp.lt.s32.totalorder %v3870_v56, 0 }
 0x10b   :  { %v1362_v23 = vand.u32 31, %v1360_v54  ;;  %vm230_vm11 = vcmp.eq.f32.partialorder %v4138_v60, 0.0  ;;  %v231_v57 = vand.u32 2147483648, %v4138_v60  ;;  %v1355_v14 = vand.u32 8388607, %v1348_v40 }
 0x10c   :  { %v3014_v39 = vpop.eup %3013  ;;  %v4285_v59 = vshrl.u32 %v894_v63, 30  ;;  %v1020_v52 = vxor.u32 2147483648, %v1019_v17  ;;  %v229_v11 = vsel %vm228_vm8, %v4138_v60, %v227_v25  ;;  %vm221_vm12 = vcmp.eq.f32.partialorder %v4185_v62, inf  ;;  %v4352_v63 = vpop.permute.xlu1 %328 }
 0x10d   :  { %v1363_v10 = vsub.s32 32, %v1362_v23  ;;  %v1023_v27 = vsel %vm938_vm10, %v1022_v18, %v4118_v36  ;;  %v220_v26 = vmul.f32 %v3014_v39, %v4185_v62  ;;  %v4299_v34 = vshrl.u32 %v1360_v54, 5  ;;  %v4345_v54 = vld [vmem:[%s4657_s3 + $0x40] sm:$0xff] }
 0x10e   :  { %v896_v45 = vshll.u32 %v4285_v59, 30  ;;  %v1365_v50 = vshll.u32 %v3041_v2, %v1362_v23  ;;  %v1368_v0 = vshll.u32 %v3042_v5, %v1362_v23  ;;  %v1371_v47 = vshll.u32 %v3043_v7, %v1362_v23 }
 0x10f   :  { %v1366_v8 = vshrl.u32 %v3042_v5, %v1363_v10  ;;  %v1369_v6 = vshrl.u32 %v3043_v7, %v1363_v10  ;;  %v1372_v15 = vshrl.u32 %v3044_v9, %v1363_v10  ;;  %v1374_v36 = vshll.u32 %v3044_v9, %v1362_v23 }
 0x110   :  { %v4302_v19 = vsub.s32 %v893_v33, %v896_v45  ;;  %v1375_v58 = vshrl.u32 %v3045_v13, %v1363_v10  ;;  %v1021_v49 = vsel %vm938_vm10, %v1020_v52, %v1019_v17  ;;  %v4315_v22 = vsel %vm230_vm11, %v231_v57, %v229_v11 }
 0x111   :  { %v1356_v24 = vor.u32 8388608, %v1355_v14  ;;  %v4320_v37 = vsel %vm4281_vm9, 0, %v1023_v27  ;;  %v224_v31 = vand.u32 2147483648, %v4185_v62  ;;  %v1377_v51 = vshll.u32 %v3045_v13, %v1362_v23  ;;  %v4367_v14 = vpop.permute.xlu0 %323 }
 0x112   :  { %v899_v53 = vsub.s32 0, %v4302_v19  ;;  %v1378_v61 = vshrl.u32 %v3046_v21, %v1363_v10  ;;  %vm123_vm13 = vcmp.eq.f32.partialorder %v4082_v1, 0.0  ;;  %v222_v60 = vsel %vm221_vm12, %v4185_v62, %v220_v26 }
 0x113   :  { %v1367_v3 = vor.u32 %v1366_v8, %v1365_v50  ;;  %v1370_v44 = vor.u32 %v1369_v6, %v1368_v0  ;;  %v1024_v28 = vsel %vm4281_vm9, %v3870_v56, %v1021_v49  ;;  %v1373_v41 = vor.u32 %v1372_v15, %v1371_v47 }
 0x114   :  { %v2753_v38 = vmin.u32 %v899_v53, %v4302_v19  ;;  %v1376_v32 = vor.u32 %v1375_v58, %v1374_v36  ;;  %vm1380_vm14 = vcmp.lt.s32.totalorder %v4299_v34, 1  ;;  %vm835_vm1 = vcmp.lt.s32.totalorder %v4032_v46, 0  ;;  %v369_v58 = vpop.permute.xlu1 %368 }
 0x115   :  { %vm223_vm2 = vcmp.eq.f32.partialorder %v4185_v62, 0.0  ;;  %v1364_v4 = vshrl.u32 %v3041_v2, %v1363_v10  ;;  %vm1383_vm3 = vcmp.lt.s32.totalorder %v4299_v34, 4  ;;  %v4340_v33 = vshll.u32 %v1356_v24, 8 }
 0x116   :  { %v901_v55 = vclz %v2753_v38  ;;  %v889_v56 = vadd.s32 %v4241_v20, %v4252_v35  ;;  %v1379_v17 = vor.u32 %v1378_v61, %v1377_v51  ;;  %vm1382_vm4 = vcmp.lt.s32.totalorder %v4299_v34, 3 }
 0x117   :  { %v1385_v25 = vsel %vm1383_vm3, %v1373_v41, 2102212464  ;;  %3015 = vcosq.f32 %v1024_v28  ;;  %vm1381_vm0 = vcmp.lt.s32.totalorder %v4299_v34, 2  ;;  %v1388_v39 = vsel %vm1380_vm14, %v1367_v3, %v1370_v44 }
 0x118   :  { %v2754_v23 = vadd.s32 4294967294, %v901_v55  ;;  %3017 = vsinq.f32 %v1024_v28  ;;  %v919_v18 = vsub.s32 4, %v4285_v59  ;;  %v1389_v20 = vsel %vm1383_vm3, %v1376_v32, 920167782 }
 0x119   :  { %v1248_v35 = vand.u32 2139095040, %v4345_v54  ;;  %v1384_v16 = vsel %vm1380_vm14, %v1364_v4, %v1367_v3  ;;  %v1386_v10 = vsel %vm1382_vm4, %v1370_v44, %v1385_v25  ;;  %v1390_v57 = vsel %vm1382_vm4, %v1373_v41, %v1389_v20 }
 0x11a   :  { %vm2755_vm15 = vcmp.lt.s32.totalorder %v2754_v23, 0  ;;  %v1391_v11 = vsel %vm1381_vm0, %v1388_v39, %v1390_v57  ;;  %v1392_v45 = vsel %vm1380_vm14, %v1370_v44, %v1373_v41  ;;  %v1393_v27 = vsel %vm1383_vm3, %v1379_v17, 1326507024 }
 0x11b   :  { %v904_v52 = vsel %vm2755_vm15, 0, %v2754_v23  ;;  %v1394_v0 = vsel %vm1382_vm4, %v1376_v32, %v1393_v27  ;;  %v1387_v6 = vsel %vm1381_vm0, %v1384_v16, %v1386_v10  ;;  %v125_v51 = vsel %vm123_vm13, %v124_v48, %v4277_v43  ;;  %v364_v48 = vpop.permute.xlu0 %363 }
 0x11c   :  { %v905_v26 = vsub.s32 32, %v904_v52  ;;  %v906_v50 = vshll.u32 %v4302_v19, %v904_v52  ;;  %v909_v8 = vsub.s32 4294967266, %v904_v52  ;;  %v1395_v47 = vsel %vm1381_vm0, %v1392_v45, %v1394_v0 }
 0x11d   :  { %v4383_v15 = vmul.u32.u64.low %v4340_v33, %v1391_v11  ;;  %v4384_v36 = vmul.u32.u64.high %v4340_v33, %v1391_v11, %v4383_v15  ;;  %v4388_v19 = vmul.u32.u64.low %v4340_v33, %v1395_v47  ;;  %v4389_v24 = vmul.u32.u64.high %v4340_v33, %v1395_v47, %v4388_v19 }
 0x11e   :  { %v907_v49 = vshrl.u32 %v889_v56, %v905_v26  ;;  %v910_v53 = vadd.s32 127, %v909_v8  ;;  %v2074_v34 = vadd.s32 3, %v4320_v37  ;;  %v920_v61 = vsel %vm835_vm1, %v919_v18, %v4285_v59 }
 0x11f   :  { %v1249_v38 = vshrl.u32 %v1248_v35, 23  ;;  %vm4402_vm5 = vcmp.le.f32.partialorder %v833_v42, 0.7853982  ;;  %v1403_v41 = vmul.u32 %v4340_v33, %v1387_v6  ;;  %v396_v1 = vmul.f32 %v369_v58, %v4315_v22 }
 0x120   :  { %v908_v44 = vor.u32 %v907_v49, %v906_v50  ;;  %v911_v28 = vshll.u32 %v910_v53, 23  ;;  %v225_v43 = vsel %vm223_vm2, %v224_v31, %v222_v60  ;;  %v1406_v59 = vadd.s32 1, %v4384_v36 }
 0x121   :  { %v2768_v32 = vadd.s32 4294967169, %v1249_v38  ;;  %v3016_v55 = vpop.eup %3015  ;;  %v922_v56 = vsel %vm4402_vm5, 0, %v920_v61  ;;  %vm1405_vm6 = vc.u32 %v4389_v24, %v4383_v15  ;;  %v4418_v22 = vand.u32 3, %v4320_v37  ;;  %v3039_v61 = vld [vmem:[%s4657_s3 + $0x28] sm:$0xff] }
 0x122   :  { %v912_v42 = vor.u32 4788187, %v911_v28  ;;  %v915_v4 = vcvt.s32.f32 %v908_v44  ;;  %v3018_v33 = vpop.eup %3017  ;;  %v4420_v17 = vand.u32 3, %v2074_v34  ;;  %v1407_v62 = vsel %vm1405_vm6, %v1406_v59, %v4384_v36 }
 0x123   :  { %v1255_v31 = vadd.s32 1, %v2768_v32  ;;  %v335_v60 = vmul.f32 %v4330_v29, %v125_v51  ;;  %v395_v23 = vmul.f32 %v364_v48, %v225_v43  ;;  %v1408_v39 = vadd.s32 %v1407_v62, %v1403_v41 }
 0x124   :  { %v913_v25 = vand.u32 2147483647, %v912_v42  ;;  %v4425_v18 = vadd.f32 %v396_v1, %v4271_v12  ;;  %v1970_v20 = vadd.s32 3, %v922_v56  ;;  %v1245_v35 = vand.u32 2147483647, %v4345_v54 }
 0x125   :  { %vm1256_vm7 = vcmp.gt.s32.totalorder %v1255_v31, 0  ;;  %v1035_v16 = vxor.u32 2147483648, %v3016_v55  ;;  %v1409_v10 = vadd.s32 536870912, %v1408_v39  ;;  %vm1031_vm8 = vcmp.eq.s32.totalorder %v4418_v22, 0 }
 0x126   :  { %v916_v37 = vmul.f32 %v915_v4, %v913_v25  ;;  %v1257_v57 = vsel %vm1256_vm7, %v1255_v31, 0  ;;  %vm1034_vm9 = vcmp.eq.s32.totalorder %v4418_v22, 2  ;;  %vm2077_vm10 = vcmp.eq.s32.totalorder %v4420_v17, 0 }
 0x127   :  { %v1259_v29 = vand.u32 31, %v1257_v57  ;;  %vm1030_vm11 = vcmp.lt.s32.totalorder %v4418_v22, 2  ;;  %vm2076_vm12 = vcmp.lt.s32.totalorder %v4420_v17, 2  ;;  %vm2080_vm13 = vcmp.eq.s32.totalorder %v4420_v17, 2 }
 0x128   :  { %v917_v12 = vxor.u32 2147483648, %v916_v37  ;;  %v4434_v52 = vadd.f32 %v395_v23, %v335_v60  ;;  %v4436_v11 = vshrl.u32 %v1409_v10, 30  ;;  %v1032_v45 = vxor.u32 2147483648, %v3018_v33 }
 0x129   :  { %v4438_v27 = vand.u32 3, %v922_v56  ;;  %v1252_v26 = vand.u32 8388607, %v1245_v35  ;;  %v1260_v50 = vsub.s32 32, %v1259_v29  ;;  %v1036_v8 = vsel %vm1034_vm9, %v1035_v16, %v3018_v33 }
 0x12a   :  { %v918_v0 = vsel %vm835_vm1, %v917_v12, %v916_v37  ;;  %v4444_v6 = vand.u32 3, %v1970_v20  ;;  %v1411_v47 = vshll.u32 %v4436_v11, 30  ;;  %v2082_v36 = vsel %vm2080_vm13, %v1035_v16, %v3018_v33 }
 0x12b   :  { %v921_v58 = vsel %vm4402_vm5, %v4032_v46, %v918_v0  ;;  %v1262_v49 = vshll.u32 %v3041_v2, %v1259_v29  ;;  %v1265_v53 = vshll.u32 %v3042_v5, %v1259_v29  ;;  %v1263_v51 = vshrl.u32 %v3042_v5, %v1260_v50 }
 0x12c   :  { %3019 = vcosq.f32 %v921_v58  ;;  %v4452_v19 = vsub.s32 %v1408_v39, %v1411_v47  ;;  %v1268_v34 = vshll.u32 %v3043_v7, %v1259_v29  ;;  %vm1028_vm14 = vweird.f32 %v3039_v61 }
 0x12d   :  { %3021 = vsinq.f32 %v921_v58  ;;  %v1266_v38 = vshrl.u32 %v3043_v7, %v1260_v50  ;;  %v1269_v3 = vshrl.u32 %v3044_v9, %v1260_v50  ;;  %v1271_v44 = vshll.u32 %v3044_v9, %v1259_v29 }
 0x12e   :  { %v1033_v28 = vsel %vm1031_vm8, %v3016_v55, %v1032_v45  ;;  %v2079_v5 = vsel %vm2077_vm10, %v3016_v55, %v1032_v45  ;;  %vm931_vm1 = vcmp.eq.s32.totalorder %v4438_v27, 2  ;;  %v1414_v41 = vsub.s32 0, %v4452_v19 }
 0x12f   :  { %v1258_v1 = vshrl.u32 %v1257_v57, 5  ;;  %vm928_vm2 = vcmp.eq.s32.totalorder %v4438_v27, 0  ;;  %v1253_v48 = vor.u32 8388608, %v1252_v26  ;;  %v1272_v7 = vshrl.u32 %v3045_v13, %v1260_v50 }
 0x130   :  { %v1274_v43 = vshll.u32 %v3045_v13, %v1259_v29  ;;  %v1275_v9 = vshrl.u32 %v3046_v21, %v1260_v50  ;;  %vm927_vm3 = vcmp.lt.s32.totalorder %v4438_v27, 2  ;;  %vm1972_vm4 = vcmp.lt.s32.totalorder %v4444_v6, 2 }
 0x131   :  { %v2773_v59 = vmin.u32 %v1414_v41, %v4452_v19  ;;  %v1261_v32 = vshrl.u32 %v3041_v2, %v1260_v50  ;;  %v1264_v55 = vor.u32 %v1263_v51, %v1262_v49  ;;  %vm925_vm0 = vweird.f32 %v4032_v46 }
 0x132   :  { %v1267_v42 = vor.u32 %v1266_v38, %v1265_v53  ;;  %v1270_v4 = vor.u32 %v1269_v3, %v1268_v34  ;;  %v1273_v56 = vor.u32 %v1272_v7, %v1271_v44  ;;  %v1276_v33 = vor.u32 %v1275_v9, %v1274_v43 }
 0x133   :  { %v1416_v62 = vclz %v2773_v59  ;;  %vm1277_vm15 = vcmp.lt.s32.totalorder %v1258_v1, 1  ;;  %vm1279_vm5 = vcmp.lt.s32.totalorder %v1258_v1, 3  ;;  %vm1280_vm6 = vcmp.lt.s32.totalorder %v1258_v1, 4 }
 0x134   :  { %v1037_v13 = vsel %vm1030_vm11, %v1033_v28, %v1036_v8  ;;  %v2083_v21 = vsel %vm2076_vm12, %v2079_v5, %v2082_v36  ;;  %vm1973_vm7 = vcmp.eq.s32.totalorder %v4444_v6, 0  ;;  %v1293_v2 = vshll.u32 %v1253_v48, 8 }
 0x135   :  { %v2774_v31 = vadd.s32 4294967294, %v1416_v62  ;;  %vm1278_vm8 = vcmp.lt.s32.totalorder %v1258_v1, 2  ;;  %v1282_v60 = vsel %vm1280_vm6, %v1270_v4, 2102212464  ;;  %v1286_v25 = vsel %vm1280_vm6, %v1273_v56, 920167782 }
 0x136   :  { %v1285_v23 = vsel %vm1277_vm15, %v1264_v55, %v1267_v42  ;;  %v1287_v39 = vsel %vm1279_vm5, %v1270_v4, %v1286_v25  ;;  %v1289_v20 = vsel %vm1277_vm15, %v1267_v42, %v1270_v4  ;;  %v1290_v16 = vsel %vm1280_vm6, %v1276_v33, 1326507024  ;;  %v3020_v37 = vpop.eup %3019  ;;  %v37_v25 = vld [vmem:[%s4659_s0 + $0x80] sm:$0xff] }
 0x137   :  { %vm1976_vm9 = vcmp.eq.s32.totalorder %v4444_v6, 2  ;;  %vm2775_vm10 = vcmp.lt.s32.totalorder %v2774_v31, 0  ;;  %v1281_v22 = vsel %vm1277_vm15, %v1261_v32, %v1264_v55  ;;  %v1291_v17 = vsel %vm1279_vm5, %v1273_v56, %v1290_v16  ;;  %v3022_v10 = vpop.eup %3021  ;;  %v60_v16 = vld [vmem:[%s4658_s1 + $0x98] sm:$0xf] }
 0x138   :  { %v932_v57 = vxor.u32 2147483648, %v3020_v37  ;;  %v1419_v29 = vsel %vm2775_vm10, 0, %v2774_v31  ;;  %v1283_v12 = vsel %vm1279_vm5, %v1267_v42, %v1282_v60  ;;  %v1292_v45 = vsel %vm1278_vm8, %v1289_v20, %v1291_v17  ;;  %v40_v31 = vld [vmem:[%s4659_s0 + $0x98] sm:$0xf]  ;;  %v59_v20 = vld [vmem:[%s4658_s1 + $0x90] sm:$0xf] }
 0x139   :  { %v1038_v26 = vsel %vm1028_vm14, nan, %v1037_v13  ;;  %v2084_v50 = vsel %vm1028_vm14, nan, %v2083_v21  ;;  %v929_v8 = vxor.u32 2147483648, %v3022_v10  ;;  %v1288_v0 = vsel %vm1278_vm8, %v1285_v23, %v1287_v39  ;;  %v38_v23 = vld [vmem:[%s4659_s0 + $0x88] sm:$0xff] }
 0x13a   :  { %v933_v47 = vsel %vm931_vm1, %v932_v57, %v3022_v10  ;;  %v1978_v36 = vsel %vm1976_vm9, %v932_v57, %v3022_v10  ;;  %v4495_v58 = vmul.u32.u64.low %v1293_v2, %v1292_v45  ;;  %v4496_v49 = vmul.u32.u64.high %v1293_v2, %v1292_v45, %v4495_v58  ;;  %v57_v10 = vld [vmem:[%s4658_s1 + $0x80] sm:$0xff]  ;;  %v58_v57 = vld [vmem:[%s4658_s1 + $0x88] sm:$0xff] }
 0x13b   :  { %v930_v53 = vsel %vm928_vm2, %v3020_v37, %v929_v8  ;;  %v1975_v51 = vsel %vm1973_vm7, %v3020_v37, %v929_v8  ;;  %v1424_v34 = vsub.s32 4294967266, %v1419_v29  ;;  %v1284_v61 = vsel %vm1278_vm8, %v1281_v22, %v1283_v12 }
 0x13c   :  { %v934_v38 = vsel %vm927_vm3, %v930_v53, %v933_v47  ;;  %v1979_v3 = vsel %vm1972_vm4, %v1975_v51, %v1978_v36  ;;  %v4507_v44 = vmul.u32.u64.low %v1293_v2, %v1288_v0  ;;  %v4508_v28 = vmul.u32.u64.high %v1293_v2, %v1288_v0, %v4507_v44 }
 0x13d   :  { %v935_v5 = vsel %vm925_vm0, nan, %v934_v38  ;;  %v1980_v41 = vsel %vm925_vm0, nan, %v1979_v3  ;;  %v1456_v48 = vmul.f32 %v1038_v26, %v4425_v18  ;;  %v2506_v1 = vmul.f32 %v2084_v50, %v4425_v18 }
 0x13e   :  { %v1455_v7 = vmul.f32 %v935_v5, %v4434_v52  ;;  %v2505_v27 = vmul.f32 %v1980_v41, %v4434_v52  ;;  %v1404_v6 = vadd.s32 %v4383_v15, %v4389_v24  ;;  %v1420_v43 = vsub.s32 32, %v1419_v29  ;;  %v384_v41 = vpop.permute.xlu0 %383 }
 0x13f   :  { %v1300_v9 = vmul.u32 %v1293_v2, %v1284_v61  ;;  %vm1302_vm11 = vc.u32 %v4496_v49, %v4507_v44  ;;  %v1425_v59 = vadd.s32 127, %v1424_v34  ;;  %v1303_v32 = vadd.s32 1, %v4508_v28  ;;  %v39_v2 = vld [vmem:[%s4659_s0 + $0x90] sm:$0xf] }
 0x140   :  { %v2516_v46 = vpack.c.bf16 %v2506_v1, %v2505_v27  ;;  %v2515_v55 = vpack.c.bf16 %v1456_v48, %v1455_v7  ;;  %v1421_v4 = vshll.u32 %v4452_v19, %v1419_v29  ;;  %v1422_v52 = vshrl.u32 %v1404_v6, %v1420_v43 }
 0x141   :  { %v1304_v42 = vsel %vm1302_vm11, %v1303_v32, %v4508_v28  ;;  %v1426_v56 = vshll.u32 %v1425_v59, 23  ;;  %v70_v37 = vmul.f32 %v39_v2, %v39_v2  ;;  %v80_v22 = vmul.f32 %v40_v31, %v40_v31 }
 0x142   :  { %2697 = vmatprep.mubr.bf16.mxu0 %v2516_v46  ;;  %v1305_v18 = vadd.s32 %v1304_v42, %v1300_v9  ;;  %v1423_v24 = vor.u32 %v1422_v52, %v1421_v4  ;;  %v69_v29 = vmul.f32 %v37_v25, %v37_v25  ;;  %v79_v12 = vmul.f32 %v38_v23, %v38_v23 }
 0x143   :  { %2698 = vmatmul.mubr.bf16.gmra.mrb[8].mxu0 %v2515_v55  ;;  %v1427_v62 = vor.u32 4788187, %v1426_v56  ;;  %v170_v26 = vmul.f32 %v59_v20, %v59_v20  ;;  %v180_v50 = vmul.f32 %v60_v16, %v60_v16  ;;  %v169_v0 = vmul.f32 %v57_v10, %v57_v10 }
 0x144   :  { %v1306_v33 = vadd.s32 536870912, %v1305_v18  ;;  %v1430_v19 = vcvt.s32.f32 %v1423_v24  ;;  %v179_v47 = vmul.f32 %v58_v57, %v58_v57  ;;  %v4551_v36 = vadd.f32 %v80_v22, %v70_v37 }
 0x145   :  { %v1428_v60 = vand.u32 2147483647, %v1427_v62  ;;  %v4553_v53 = vadd.f32 %v79_v12, %v69_v29  ;;  %vm1350_vm12 = vcmp.lt.s32.totalorder %v4176_v30, 0  ;;  %v4556_v34 = vadd.f32 %v180_v50, %v170_v26 }
 0x146   :  { %v4524_v15 = vshrl.u32 %v1306_v33, 30  ;;  %v1301_v61 = vadd.s32 %v4507_v44, %v4496_v49  ;;  %v4559_v3 = vadd.f32 %v179_v47, %v169_v0  ;;  %3023 = vrsqrt.f32 %v4551_v36 }
 0x147   :  { %v1431_v45 = vmul.f32 %v1430_v19, %v1428_v60  ;;  %3025 = vrsqrt.f32 %v4553_v53  ;;  %vm4565_vm14 = vcmp.le.f32.partialorder %v1348_v40, 0.7853982  ;;  %v1434_v27 = vsub.s32 4, %v4436_v11 }
 0x148   :  { %v1308_v13 = vshll.u32 %v4524_v15, 30  ;;  %3027 = vrsqrt.f32 %v4556_v34  ;;  %v1331_v56 = vsub.s32 4, %v4524_v15  ;;  %vm156_vm1 = vcmp.eq.f32.partialorder %v4551_v36, inf }
 0x149   :  { %v1432_v51 = vxor.u32 2147483648, %v1431_v45  ;;  %3029 = vrsqrt.f32 %v4559_v3  ;;  %v1435_v4 = vsel %vm1350_vm12, %v1434_v27, %v4436_v11  ;;  %vm1247_vm2 = vcmp.lt.s32.totalorder %v4345_v54, 0 }
 0x14a   :  { %v1309_v21 = vsub.s32 %v1305_v18, %v1308_v13  ;;  %v1437_v62 = vsel %vm4565_vm14, 0, %v1435_v4  ;;  %vm1246_vm3 = vcmp.le.f32.partialorder %v1245_v35, 0.7853982  ;;  %v1332_v60 = vsel %vm1247_vm2, %v1331_v56, %v4524_v15 }
 0x14b   :  { %v1433_v48 = vsel %vm1350_vm12, %v1432_v51, %v1431_v45  ;;  %vm158_vm4 = vcmp.eq.f32.partialorder %v4551_v36, 0.0  ;;  %v159_v19 = vand.u32 2147483648, %v4551_v36  ;;  %v2490_v23 = vadd.s32 3, %v1437_v62 }
 0x14c   :  { %v1311_v39 = vsub.s32 0, %v1309_v21  ;;  %v1436_v40 = vsel %vm4565_vm14, %v4176_v30, %v1433_v48  ;;  %vm149_vm0 = vcmp.eq.f32.partialorder %v4553_v53, inf  ;;  %vm151_vm15 = vcmp.eq.f32.partialorder %v4553_v53, 0.0 }
 0x14d   :  { %3031 = vcosq.f32 %v1436_v40  ;;  %v1334_v37 = vsel %vm1246_vm3, 0, %v1332_v60  ;;  %vm256_vm5 = vcmp.eq.f32.partialorder %v4556_v34, inf  ;;  %vm249_vm6 = vcmp.eq.f32.partialorder %v4559_v3, inf }
 0x14e   :  { %v2769_v17 = vmin.u32 %v1311_v39, %v1309_v21  ;;  %3033 = vsinq.f32 %v1436_v40  ;;  %v152_v39 = vand.u32 2147483648, %v4553_v53  ;;  %v1441_v29 = vand.u32 3, %v1437_v62 }
 0x14f   :  { %v2491_v12 = vand.u32 3, %v2490_v23  ;;  %v259_v45 = vand.u32 2147483648, %v4556_v34  ;;  %v2386_v26 = vadd.s32 3, %v1334_v37  ;;  %v252_v50 = vand.u32 2147483648, %v4559_v3 }
 0x150   :  { %v1313_v8 = vclz %v2769_v17  ;;  %v3024_v33 = vpop.eup %3023  ;;  %vm258_vm7 = vcmp.eq.f32.partialorder %v4556_v34, 0.0  ;;  %vm251_vm8 = vcmp.eq.f32.partialorder %v4559_v3, 0.0  ;;  %vm1443_vm9 = vcmp.eq.s32.totalorder %v1441_v29, 0 }
 0x151   :  { %v3026_v24 = vpop.eup %3025  ;;  %v155_v2 = vmul.f32 %v3024_v33, %v4551_v36  ;;  %vm1446_vm10 = vcmp.eq.s32.totalorder %v1441_v29, 2  ;;  %vm2493_vm11 = vcmp.eq.s32.totalorder %v2491_v12, 0  ;;  %vm2496_vm12 = vcmp.eq.s32.totalorder %v2491_v12, 2 }
 0x152   :  { %v2770_v58 = vadd.s32 4294967294, %v1313_v8  ;;  %v148_v25 = vmul.f32 %v3026_v24, %v4553_v53  ;;  %vm2492_vm14 = vcmp.lt.s32.totalorder %v2491_v12, 2 }
 0x153   :  { %v157_v17 = vsel %vm156_vm1, %v4551_v36, %v155_v2  ;;  %vm1440_vm1 = vweird.f32 %v4176_v30 }
 0x154   :  { %vm2771_vm13 = vcmp.lt.s32.totalorder %v2770_v58, 0  ;;  %v150_v57 = vsel %vm149_vm0, %v4553_v53, %v148_v25  ;;  %v160_v47 = vsel %vm158_vm4, %v159_v19, %v157_v17 }
 0x155   :  { %v1316_v38 = vsel %vm2771_vm13, 0, %v2770_v58  ;;  %v153_v58 = vsel %vm151_vm15, %v152_v39, %v150_v57  ;;  %vm1442_vm13 = vcmp.lt.s32.totalorder %v1441_v29, 2  ;;  %v340_v53 = vmul.f32 %v4352_v63, %v160_v47 }
 0x156   :  { %v1317_v28 = vsub.s32 32, %v1316_v38  ;;  %v1318_v5 = vshll.u32 %v1309_v21, %v1316_v38  ;;  %v1321_v49 = vsub.s32 4294967266, %v1316_v38  ;;  %v3028_v21 = vpop.eup %3027  ;;  %v389_v38 = vpop.permute.xlu1 %388  ;;  %vm1337_vm15 = vweird.f32 %v4345_v54 }
 0x157   :  { %v3030_v11 = vpop.eup %3029  ;;  %v255_v16 = vmul.f32 %v3028_v21, %v4556_v34 }
 0x158   :  { %v1319_v44 = vshrl.u32 %v1301_v61, %v1317_v28  ;;  %v1322_v1 = vadd.s32 127, %v1321_v49  ;;  %v248_v15 = vmul.f32 %v3030_v11, %v4559_v3  ;;  %v3032_v22 = vpop.eup %3031 }
 0x159   :  { %v3034_v10 = vpop.eup %3033  ;;  %v257_v8 = vsel %vm256_vm5, %v4556_v34, %v255_v16  ;;  %v1447_v61 = vxor.u32 2147483648, %v3032_v22  ;;  %v2387_v34 = vand.u32 3, %v2386_v26 }
 0x15a   :  { %v1320_v6 = vor.u32 %v1319_v44, %v1318_v5  ;;  %v1323_v9 = vshll.u32 %v1322_v1, 23  ;;  %v250_v0 = vsel %vm249_vm6, %v4559_v3, %v248_v15  ;;  %v1444_v51 = vxor.u32 2147483648, %v3034_v10 }
 0x15b   :  { %v260_v28 = vsel %vm258_vm7, %v259_v45, %v257_v8  ;;  %v1338_v5 = vand.u32 3, %v1334_v37  ;;  %v253_v48 = vsel %vm251_vm8, %v252_v50, %v250_v0  ;;  %v1448_v36 = vsel %vm1446_vm10, %v1447_v61, %v3034_v10 }
 0x15c   :  { %v1324_v55 = vor.u32 4788187, %v1323_v9  ;;  %v1327_v42 = vcvt.s32.f32 %v1320_v6  ;;  %v1445_v3 = vsel %vm1443_vm9, %v3032_v22, %v1444_v51  ;;  %v2495_v49 = vsel %vm2493_vm11, %v3032_v22, %v1444_v51 }
 0x15d   :  { %v2498_v44 = vsel %vm2496_vm12, %v1447_v61, %v3034_v10  ;;  %v339_v1 = vmul.f32 %v4367_v14, %v153_v58  ;;  %v399_v27 = vmul.f32 %v384_v41, %v253_v48  ;;  %vm2392_vm4 = vcmp.eq.s32.totalorder %v2387_v34, 2 }
 0x15e   :  { %v1325_v52 = vand.u32 2147483647, %v1324_v55  ;;  %v2499_v9 = vsel %vm2492_vm14, %v2495_v49, %v2498_v44  ;;  %vm2389_vm0 = vcmp.eq.s32.totalorder %v2387_v34, 0  ;;  %vm1339_vm5 = vcmp.lt.s32.totalorder %v1338_v5, 2 }
 0x15f   :  { %vm2388_vm6 = vcmp.lt.s32.totalorder %v2387_v34, 2  ;;  %v409_v55 = vadd.f32 %v399_v27, %v339_v1 }
 0x160   :  { %v1328_v13 = vmul.f32 %v1327_v42, %v1325_v52 }
 0x162   :  { %v1329_v31 = vxor.u32 2147483648, %v1328_v13 }
 0x164   :  { %v2848_v7 = vpop.f32.mrb[0].mxu0  ;;  %v1330_v20 = vsel %vm1247_vm2, %v1329_v31, %v1328_v13  ;;  %vm1340_vm2 = vcmp.eq.s32.totalorder %v1338_v5, 0 }
 0x165   :  { %v2849_v43 = vpop.f32.mrb[1].mxu0  ;;  %v1333_v35 = vsel %vm1246_vm3, %v4345_v54, %v1330_v20  ;;  %vm1343_vm3 = vcmp.eq.s32.totalorder %v1338_v5, 2 }
 0x166   :  { %v2850_v59 = vadd.f32 %v2849_v43, %v2848_v7  ;;  %v2851_v32 = vpop.f32.mrb[2].mxu0  ;;  %3035 = vcosq.f32 %v1333_v35  ;;  %v400_v7 = vmul.f32 %v389_v38, %v260_v28  ;;  %v1449_v43 = vsel %vm1442_vm13, %v1445_v3, %v1448_v36 }
 0x167   :  { %v2852_v46 = vpop.f32.mrb[3].mxu0  ;;  %3037 = vsinq.f32 %v1333_v35  ;;  %v1450_v42 = vsel %vm1440_vm1, nan, %v1449_v43 }
 0x168   :  { %2722 = vst [vmem:[%s4660_s5] sm:$0xff] %v2850_v59  ;;  %v2853_v18 = vadd.f32 %v2852_v46, %v2851_v32  ;;  %v410_v14 = vadd.f32 %v400_v7, %v340_v53 }
 0x16a   :  { %2723 = vst [vmem:[%s4660_s5 + $0x8] sm:$0xff] %v2853_v18  ;;  %v2500_v18 = vsel %vm1440_vm1, nan, %v2499_v9  ;;  %v1460_v62 = vmul.f32 %v1450_v42, %v410_v14 }
 0x16b   :  { %v2510_v13 = vmul.f32 %v2500_v18, %v410_v14 }
 0x170   :  { %v3036_v40 = vpop.eup %3035 }
 0x171   :  { %v3038_v6 = vpop.eup %3037  ;;  %v1344_v59 = vxor.u32 2147483648, %v3036_v40 }
 0x172   :  { %v1341_v63 = vxor.u32 2147483648, %v3038_v6 }
 0x173   :  { %v1345_v32 = vsel %vm1343_vm3, %v1344_v59, %v3038_v6  ;;  %v2394_v46 = vsel %vm2392_vm4, %v1344_v59, %v3038_v6 }
 0x174   :  { %v1342_v4 = vsel %vm1340_vm2, %v3036_v40, %v1341_v63  ;;  %v2391_v52 = vsel %vm2389_vm0, %v3036_v40, %v1341_v63 }
 0x175   :  { %v1346_v56 = vsel %vm1339_vm5, %v1342_v4, %v1345_v32  ;;  %v2395_v33 = vsel %vm2388_vm6, %v2391_v52, %v2394_v46 }
 0x176   :  { %v1347_v24 = vsel %vm1337_vm15, nan, %v1346_v56  ;;  %v2396_v54 = vsel %vm1337_vm15, nan, %v2395_v33 }
 0x177   :  { %v1459_v21 = vmul.f32 %v1347_v24, %v409_v55  ;;  %v2509_v11 = vmul.f32 %v2396_v54, %v409_v55 }
 0x179   :  { %v2520_v2 = vpack.c.bf16 %v2510_v13, %v2509_v11  ;;  %v2519_v31 = vpack.c.bf16 %v1460_v62, %v1459_v21 }
 0x17b   :  { %2713 = vmatprep.mubr.bf16.mxu1 %v2520_v2 }
 0x17c   :  { %2714 = vmatmul.mubr.bf16.gmra.mrb[4].mxu1 %v2519_v31 }
 0x194   :  { %v2854_v60 = vpop.f32.mrb[4].mxu0 }
 0x195   :  { %v2855_v19 = vpop.f32.mrb[5].mxu0 }
 0x196   :  { %v2856_v25 = vadd.f32 %v2855_v19, %v2854_v60  ;;  %v2857_v30 = vpop.f32.mrb[6].mxu0 }
 0x197   :  { %v2858_v23 = vpop.f32.mrb[7].mxu0 }
 0x198   :  { %2724 = vst [vmem:[%s4660_s5 + $0x10] sm:$0xff] %v2856_v25  ;;  %v2859_v39 = vadd.f32 %v2858_v23, %v2857_v30 }
 0x19a   :  { %2725 = vst [vmem:[%s4660_s5 + $0x18] sm:$0xff] %v2859_v39 }
 0x1d5   :  { %v2866_v20 = vpop.f32.mrb[0].mxu1 }
 0x1d6   :  { %v2867_v16 = vpop.f32.mrb[1].mxu1 }
 0x1d7   :  { %v2868_v35 = vadd.f32 %v2867_v16, %v2866_v20  ;;  %v2869_v37 = vpop.f32.mrb[2].mxu1 }
 0x1d8   :  { %v2870_v15 = vpop.f32.mrb[3].mxu1 }
 0x1d9   :  { %2728 = vst [vmem:[%s4660_s5 + $0x30] sm:$0xff] %v2868_v35  ;;  %v2871_v22 = vadd.f32 %v2870_v15, %v2869_v37 }
 0x1db   :  { %2729 = vst [vmem:[%s4660_s5 + $0x38] sm:$0xff] %v2871_v22 }
 0x216   :  { %v2860_v17 = vpop.f32.mrb[8].mxu0 }
 0x217   :  { %v2861_v10 = vpop.f32.mrb[9].mxu0 }
 0x218   :  { %v2862_v57 = vadd.f32 %v2861_v10, %v2860_v17  ;;  %v2863_v29 = vpop.f32.mrb[10].mxu0 }
 0x219   :  { %v2864_v12 = vpop.f32.mrb[11].mxu0 }
 0x21a   :  { %2726 = vst [vmem:[%s4660_s5 + $0x20] sm:$0xff] %v2862_v57  ;;  %v2865_v45 = vadd.f32 %v2864_v12, %v2863_v29 }
 0x21c   :  { %2727 = vst [vmem:[%s4660_s5 + $0x28] sm:$0xff] %v2865_v45 }
 0x24f   :  { %v2872_v26 = vpop.f32.mrb[4].mxu1 }
 0x250   :  { %v2873_v50 = vpop.f32.mrb[5].mxu1 }
 0x251   :  { %v2874_v8 = vadd.f32 %v2873_v50, %v2872_v26  ;;  %v2875_v0 = vpop.f32.mrb[6].mxu1 }
 0x252   :  { %v2876_v47 = vpop.f32.mrb[7].mxu1 }
 0x253   :  { %2730 = vst [vmem:[%s4660_s5 + $0x40] sm:$0xff] %v2874_v8  ;;  %v2877_v58 = vadd.f32 %v2876_v47, %v2875_v0 }
 0x255   :  { %2731 = vst [vmem:[%s4660_s5 + $0x48] sm:$0xf] %v2877_v58 }

</bundles_post_ra>
